<compile_context>
chip_gen: v6e
topology: v6e:2x2x1
jax: 0.10.0
libtpu: 0.0.40
codegen_flags: <defaults>
</compile_context>

<pallas_src>
import functools

import jax
import jax.numpy as jnp
import numpy as np
from jax import lax
from jax.experimental import pallas as pl
from jax.experimental.pallas import tpu as pltpu


def _round_up(v, m):
    return (v + m - 1) // m * m


def _vmem_capacity_bytes():
    try:
        info = pltpu.get_tpu_info()
        for name in ("vmem_capacity_bytes", "vmem_bytes", "vmem_size_bytes"):
            v = getattr(info, name, None)
            if v:
                return int(v)
    except Exception:
        pass
    return 64 << 20  # v7x-safe fallback (64 MiB per TensorCore)


def _scatter_mean_kernel(chunk_first_ref, nchunks_ref,   # scalar prefetch (SMEM)
                         key_ref, pf_ref,                # VMEM inputs
                         out_ref,                        # VMEM output
                         acc_ref,                        # VMEM scratch
                         *, S_pad, C, tile_s, n_s_tiles):
    """One (batch, spatial_tile, segment_chunk) grid point.

    chunk_first_ref: (num_tiles,) int32  first pillar-chunk of this tile's segment
    nchunks_ref:     (num_tiles,) int32  number of chunks in this tile's segment
    key_ref: (CH, 1)  int32    sorted combined keys (= b*S_pad + flat), sentinel pad
    pf_ref:  (cp, CH) float32  [features^T ; ones row ; zero pad], sorted like keys
    out_ref: (1, C, tile_s)    dense BEV slab for this (batch, tile)
    acc_ref: (cp, tile_s) f32  accumulator (feature sums + count row)
    """
    b = pl.program_id(0)
    s = pl.program_id(1)
    k = pl.program_id(2)
    t = b * n_s_tiles + s

    @pl.when(k == 0)
    def _():
        acc_ref[...] = jnp.zeros_like(acc_ref)

    # Only chunks overlapping this tile's pillar segment do work; the index_map
    # pins the remaining k's to the same block, so they cost no extra DMA.
    @pl.when(k < nchunks_ref[t])
    def _():
        tile_base = b * S_pad + s * tile_s
        positions = tile_base + lax.broadcasted_iota(jnp.int32, (1, tile_s), 1)
        onehot = (key_ref[...] == positions).astype(jnp.float32)     # (CH, tile_s)
        # Canonical (M,K)@(K,N) MXU contraction: rows 0..C-1 = feature sums,
        # row C = per-cell count.  HIGHEST keeps f32 parity with torch.
        acc_ref[...] += jnp.dot(pf_ref[...], onehot,
                                preferred_element_type=jnp.float32,
                                precision=lax.Precision.HIGHEST)

    @pl.when(k == pl.num_programs(2) - 1)
    def _():
        acc = acc_ref[...]
        counts = acc[C:C + 1, :]                                     # (1, tile_s)
        inv = pl.reciprocal(jnp.maximum(counts, 1.0), approx=False)  # empty -> 0
        out_ref[...] = (acc[:C, :] * inv)[None].astype(out_ref.dtype)


def pointpillar_scatter3d(pillar_features, coords, *, batch_size, nz, ny, nx,
                          tile_s=None, pillar_chunk=None):
    """JAX/Pallas equivalent of PointPillarScatter3d.forward.

    pillar_features: (P, C) float, C = NUM_BEV_FEATURES // nz
    coords:          (P, 4) int32, columns [batch, z, y, x]
    returns:         (batch_size, C*nz, ny, nx)  (NCHW)
    """
    P, C = pillar_features.shape
    S = nz * ny * nx
    out_dtype = pillar_features.dtype

    # Spatial tile: sized for lane-dense output stores and few grid steps.
    if tile_s is None:
        tile_s = min(1024, _round_up(S, 128))
    tile_s = _round_up(tile_s, 128)
    S_pad = _round_up(S, tile_s)
    n_s_tiles = S_pad // tile_s
    num_tiles = batch_size * n_s_tiles

    # Pillar chunk: the unit the data-dependent index_map streams.
    if pillar_chunk is None:
        pillar_chunk = min(1024, _round_up(max(P, 1), 128))
    CH = _round_up(pillar_chunk, 128)
    P_pad = _round_up(max(P, 1), CH)
    n_chunks_total = P_pad // CH

    cp = _round_up(C + 1, 8)          # features + count row, f32 sublane multiple

    # Combined key in the padded spatial space; invalid coords -> sentinel so
    # they can never alias into a real cell (torch_scatter would have errored).
    cb = coords[:, 0].astype(jnp.int32)
    cz = coords[:, 1].astype(jnp.int32)
    cy = coords[:, 2].astype(jnp.int32)
    cx = coords[:, 3].astype(jnp.int32)
    flat = cz * (ny * nx) + cy * nx + cx
    valid = ((cb >= 0) & (cb < batch_size) & (cz >= 0) & (cz < nz)
             & (cy >= 0) & (cy < ny) & (cx >= 0) & (cx < nx))
    sentinel = jnp.int32(batch_size * S_pad)          # > every real position
    key = jnp.where(valid, cb * S_pad + flat, sentinel).astype(jnp.int32)

    # Sort pillars by key so each spatial tile owns a contiguous segment.
    order = jnp.argsort(key)
    key_sorted = key[order]
    feats_sorted = pillar_features[order].astype(jnp.float32)
    ones_sorted = valid[order].astype(jnp.float32)

    key_pad = jnp.full((P_pad,), sentinel, jnp.int32).at[:P].set(key_sorted)
    key_col = key_pad.reshape(P_pad, 1)

    # MXU-canonical feature layout: (cp, P_pad), lane-dense along pillars.
    pf_t = jnp.zeros((cp, P_pad), jnp.float32)
    pf_t = pf_t.at[:C, :P].set(feats_sorted.T)
    pf_t = pf_t.at[C, :P].set(ones_sorted)

    # Per-tile segment -> pillar-chunk range (scalar-prefetched to SMEM).
    bounds = jnp.arange(num_tiles + 1, dtype=jnp.int32) * tile_s
    off = jnp.searchsorted(key_pad, bounds, side="left").astype(jnp.int32)
    seg_len = off[1:] - off[:-1]
    chunk_first = jnp.minimum(off[:-1] // CH, n_chunks_total - 1).astype(jnp.int32)
    chunk_last = jnp.minimum(jnp.maximum(off[1:] - 1, off[:-1]) // CH,
                             n_chunks_total - 1)
    nchunks = jnp.where(seg_len > 0, chunk_last - chunk_first + 1, 0).astype(jnp.int32)

    # Static grid extent for the reduction axis: the real per-tile maximum when
    # inputs are concrete, else the worst case (all pillars in one tile).
    try:
        max_chunks = max(1, int(jax.device_get(jnp.max(nchunks))))
    except Exception:
        max_chunks = n_chunks_total

    def _chunk_idx(b, s, k, chunk_first_ref, nchunks_ref):
        t = b * n_s_tiles + s
        kk = jnp.minimum(k, jnp.maximum(nchunks_ref[t] - 1, 0))
        return chunk_first_ref[t] + kk

    kernel = functools.partial(_scatter_mean_kernel, S_pad=S_pad, C=C,
                               tile_s=tile_s, n_s_tiles=n_s_tiles)

    # VMEM budget from the actual tiles (+ temporaries), capped by capacity.
    lane = 128
    est = (2 * CH * lane * 4                      # key block (lane-padded int32)
           + 2 * cp * CH * 4                      # feature block
           + 2 * _round_up(C, 8) * tile_s * 4     # output block
           + cp * tile_s * 4                      # accumulator scratch
           + 3 * CH * tile_s * 4)                 # one-hot / compare temporaries
    cap = _vmem_capacity_bytes()
    vmem_bytes = int(min(max(est + (4 << 20), 32 << 20),
                         max(cap - (8 << 20), 32 << 20),
                         100 << 20))

    out = pl.pallas_call(
        kernel,
        out_shape=jax.ShapeDtypeStruct((batch_size, C, S_pad), out_dtype),
        grid_spec=pltpu.PrefetchScalarGridSpec(
            num_scalar_prefetch=2,
            grid=(batch_size, n_s_tiles, max_chunks),
            in_specs=[
                pl.BlockSpec(
                    (CH, 1),
                    lambda b, s, k, cf, nc: (_chunk_idx(b, s, k, cf, nc), 0)),
                pl.BlockSpec(
                    (cp, CH),
                    lambda b, s, k, cf, nc: (0, _chunk_idx(b, s, k, cf, nc))),
            ],
            out_specs=pl.BlockSpec((1, C, tile_s),
                                   lambda b, s, k, cf, nc: (b, 0, s)),
            scratch_shapes=[pltpu.VMEM((cp, tile_s), jnp.float32)],
        ),
        compiler_params=pltpu.CompilerParams(
            dimension_semantics=("parallel", "parallel", "arbitrary"),
            vmem_limit_bytes=vmem_bytes,
        ),
    )(chunk_first, nchunks, key_col, pf_t)

    if S_pad != S:
        out = out[:, :, :S]
    # (B, C, nz*ny*nx) -> (B, C*nz, ny, nx), identical to the torch .view()
    return out.reshape(batch_size, C * nz, ny, nx)


def _reference_numpy(pillar_features, coords, batch_size, nz, ny, nx):
    P, C = pillar_features.shape
    S = nz * ny * nx
    sums = np.zeros((batch_size, C, S), dtype=np.float64)
    cnts = np.zeros((batch_size, S), dtype=np.float64)
    for p in range(P):
        b, z, y, x = (int(v) for v in coords[p])
        f = z * ny * nx + y * nx + x
        sums[b, :, f] += np.asarray(pillar_features[p], dtype=np.float64)
        cnts[b, f] += 1.0
    mean = sums / np.maximum(cnts, 1.0)[:, None, :]
    return mean.reshape(batch_size, C * nz, ny, nx).astype(np.float32)


if __name__ == "__main__":
    # Small synthetic config: INPUT_SHAPE = (nx, ny, nz), NUM_BEV_FEATURES = C*nz
    nx, ny, nz = 16, 16, 2
    num_bev_features = 8
    C = num_bev_features // nz          # features before compression = 4
    batch_size = 2
    P = 64                              # number of pillars (voxels)

    rng = jax.random.PRNGKey(0)
    k1, k2, k3, k4, k5 = jax.random.split(rng, 5)

    pillar_features = jax.random.normal(k1, (P, C), dtype=jnp.float32)
    coords = jnp.stack([
        jax.random.randint(k2, (P,), 0, batch_size, dtype=jnp.int32),
        jax.random.randint(k3, (P,), 0, nz, dtype=jnp.int32),
        jax.random.randint(k4, (P,), 0, ny, dtype=jnp.int32),
        jax.random.randint(k5, (P,), 0, nx, dtype=jnp.int32),
    ], axis=1)                           # (P, 4) [batch, z, y, x]

    spatial_features = pointpillar_scatter3d(
        pillar_features, coords, batch_size=batch_size, nz=nz, ny=ny, nx=nx)
    spatial_features = jax.block_until_ready(spatial_features)
    assert spatial_features.shape == (batch_size, C * nz, ny, nx)

    ref = _reference_numpy(np.asarray(pillar_features), np.asarray(coords),
                           batch_size, nz, ny, nx)
    # With Precision.HIGHEST the kernel matches the f64 reference to ~1e-6; the
    # tolerance below is sized so this smoke test (which validates the scatter
    # indexing / counting / batching / reshape) still passes even if the MXU
    # falls back to a lower-precision f32 mode on some generation.
    np.testing.assert_allclose(np.asarray(spatial_features), ref,
                               rtol=2e-2, atol=2e-2)
    print("KERNEL_OK")
</pallas_src>

<mosaic_0001>
module attributes {stable_mosaic.version = 11 : i64} {
  func.func @_scatter_mean_kernel(%arg0: i32, %arg1: i32, %arg2: i32, %arg3: memref<2xi32, #tpu.memory_space<smem>>, %arg4: memref<2xi32, #tpu.memory_space<smem>>, %arg5: memref<128x1xi32, #tpu.memory_space<vmem>>, %arg6: memref<8x128xf32, #tpu.memory_space<vmem>>, %arg7: memref<1x4x512xf32, #tpu.memory_space<vmem>>, %arg8: memref<8x512xf32, #tpu.memory_space<vmem>>) attributes {dimension_semantics = [#tpu.dimension_semantics<parallel>, #tpu.dimension_semantics<parallel>, #tpu.dimension_semantics<arbitrary>], iteration_bounds = array<i64: 2, 1, 1>, scalar_prefetch = 2 : i64, scratch_operands = 1 : i64, tpu.core_type = #tpu.core_type<tc>, window_params = [{transform_indices = @transform_0, window_bounds = array<i64: 128, 1>}, {transform_indices = @transform_1, window_bounds = array<i64: 8, 128>}, {transform_indices = @transform_2, window_bounds = array<i64: 1, 4, 512>}]} {
    %c1_i32 = arith.constant 1 : i32
    %0 = arith.muli %arg0, %c1_i32 : i32
    %1 = arith.addi %0, %arg1 : i32
    %c0_i32 = arith.constant 0 : i32
    %2 = arith.cmpi eq, %arg2, %c0_i32 : i32
    %3 = arith.extui %2 : i1 to i32
    %c0_i32_0 = arith.constant 0 : i32
    %4 = arith.cmpi ne, %3, %c0_i32_0 : i32
    scf.if %4 {
      %cst = arith.constant 0.000000e+00 : f32
      %13 = vector.broadcast %cst : f32 to vector<8x512xf32>
      %c0 = arith.constant 0 : index
      %c0_4 = arith.constant 0 : index
      %14 = vector.load %arg8[%c0, %c0_4] : memref<8x512xf32, #tpu.memory_space<vmem>>, vector<8x512xf32>
      tpu.vector_store %arg8[%c0, %c0_4], %13 {strides = array<i32>} : memref<8x512xf32, #tpu.memory_space<vmem>>, vector<8x512xf32>,
    } else {
    }
    %5 = arith.index_cast %1 : i32 to index
    %6 = memref.load %arg4[%5] : memref<2xi32, #tpu.memory_space<smem>>
    %7 = arith.cmpi slt, %arg2, %6 : i32
    %8 = arith.extui %7 : i1 to i32
    %c0_i32_1 = arith.constant 0 : i32
    %9 = arith.cmpi ne, %8, %c0_i32_1 : i32
    scf.if %9 {
      %c512_i32 = arith.constant 512 : i32
      %13 = arith.muli %arg0, %c512_i32 : i32
      %c512_i32_4 = arith.constant 512 : i32
      %14 = arith.muli %arg1, %c512_i32_4 : i32
      %15 = arith.addi %13, %14 : i32
      %16 = tpu.iota {dimensions = array<i32: 1>} : vector<1x512xi32>
      %17 = vector.broadcast %15 : i32 to vector<1x512xi32>
      %18 = arith.addi %17, %16 : vector<1x512xi32>
      %c0 = arith.constant 0 : index
      %c0_5 = arith.constant 0 : index
      %19 = vector.load %arg5[%c0, %c0_5] : memref<128x1xi32, #tpu.memory_space<vmem>>, vector<128x1xi32>
      %20 = vector.broadcast %19 : vector<128x1xi32> to vector<128x512xi32>
      %21 = vector.broadcast %18 : vector<1x512xi32> to vector<128x512xi32>
      %22 = arith.cmpi eq, %20, %21 : vector<128x512xi32>
      %23 = arith.extui %22 : vector<128x512xi1> to vector<128x512xi32>
      %24 = arith.sitofp %23 : vector<128x512xi32> to vector<128x512xf32>
      %c0_6 = arith.constant 0 : index
      %c0_7 = arith.constant 0 : index
      %25 = vector.load %arg8[%c0_6, %c0_7] : memref<8x512xf32, #tpu.memory_space<vmem>>, vector<8x512xf32>
      %c0_8 = arith.constant 0 : index
      %c0_9 = arith.constant 0 : index
      %26 = vector.load %arg6[%c0_8, %c0_9] : memref<8x128xf32, #tpu.memory_space<vmem>>, vector<8x128xf32>
      %cst = arith.constant dense<0.000000e+00> : vector<8x512xf32>
      %27 = tpu.matmul %26, %24, %cst {dimension_numbers = #tpu.dot_dimension_numbers<[1], [0], [0], [1], [0, 0, 1, 1], [], []>, precision = #tpu.contract_precision<fp32>} : vector<8x128xf32>, vector<128x512xf32>, vector<8x512xf32> -> vector<8x512xf32>
      %28 = arith.addf %25, %27 : vector<8x512xf32>
      %c0_10 = arith.constant 0 : index
      %c0_11 = arith.constant 0 : index
      %29 = vector.load %arg8[%c0_10, %c0_11] : memref<8x512xf32, #tpu.memory_space<vmem>>, vector<8x512xf32>
      tpu.vector_store %arg8[%c0_10, %c0_11], %28 {strides = array<i32>} : memref<8x512xf32, #tpu.memory_space<vmem>>, vector<8x512xf32>,
    } else {
    }
    %c0_i32_2 = arith.constant 0 : i32
    %10 = arith.cmpi eq, %arg2, %c0_i32_2 : i32
    %11 = arith.extui %10 : i1 to i32
    %c0_i32_3 = arith.constant 0 : i32
    %12 = arith.cmpi ne, %11, %c0_i32_3 : i32
    scf.if %12 {
      %c0 = arith.constant 0 : index
      %c0_4 = arith.constant 0 : index
      %13 = vector.load %arg8[%c0, %c0_4] : memref<8x512xf32, #tpu.memory_space<vmem>>, vector<8x512xf32>
      %14 = vector.extract_strided_slice %13 {offsets = [4, 0], sizes = [1, 512], strides = [1, 1]} : vector<8x512xf32> to vector<1x512xf32>
      %cst = arith.constant 1.000000e+00 : f32
      %15 = vector.broadcast %cst : f32 to vector<1x512xf32>
      %16 = arith.maximumf %14, %15 : vector<1x512xf32>
      %17 = tpu.reciprocal %16 : vector<1x512xf32> -> vector<1x512xf32>
      %18 = vector.extract_strided_slice %13 {offsets = [0, 0], sizes = [4, 512], strides = [1, 1]} : vector<8x512xf32> to vector<4x512xf32>
      %19 = vector.broadcast %17 : vector<1x512xf32> to vector<4x512xf32>
      %20 = arith.mulf %18, %19 : vector<4x512xf32>
      %21 = vector.shape_cast %20 : vector<4x512xf32> to vector<1x4x512xf32>
      %c0_5 = arith.constant 0 : index
      %c0_6 = arith.constant 0 : index
      %c0_7 = arith.constant 0 : index
      %22 = vector.load %arg7[%c0_5, %c0_6, %c0_7] : memref<1x4x512xf32, #tpu.memory_space<vmem>>, vector<1x4x512xf32>
      tpu.vector_store %arg7[%c0_5, %c0_6, %c0_7], %21 {strides = array<i32>} : memref<1x4x512xf32, #tpu.memory_space<vmem>>, vector<1x4x512xf32>,
    } else {
    }
    return
  }
  func.func @transform_0(%arg0: i32, %arg1: i32, %arg2: i32, %arg3: memref<2xi32, #tpu.memory_space<smem>>, %arg4: memref<2xi32, #tpu.memory_space<smem>>) -> (i32, i32) {
    %c1_i32 = arith.constant 1 : i32
    %0 = arith.muli %arg0, %c1_i32 : i32
    %1 = arith.addi %0, %arg1 : i32
    %2 = arith.index_cast %1 : i32 to index
    %3 = memref.load %arg4[%2] : memref<2xi32, #tpu.memory_space<smem>>
    %c1_i32_0 = arith.constant 1 : i32
    %4 = arith.subi %3, %c1_i32_0 : i32
    %c0_i32 = arith.constant 0 : i32
    %5 = arith.maxsi %4, %c0_i32 : i32
    %6 = arith.minsi %arg2, %5 : i32
    %7 = arith.index_cast %1 : i32 to index
    %8 = memref.load %arg3[%7] : memref<2xi32, #tpu.memory_space<smem>>
    %9 = arith.addi %8, %6 : i32
    %c0_i32_1 = arith.constant 0 : i32
    %c0_i32_2 = arith.constant 0 : i32
    return %9, %c0_i32_1 : i32, i32
  }
  func.func @transform_1(%arg0: i32, %arg1: i32, %arg2: i32, %arg3: memref<2xi32, #tpu.memory_space<smem>>, %arg4: memref<2xi32, #tpu.memory_space<smem>>) -> (i32, i32) {
    %c1_i32 = arith.constant 1 : i32
    %0 = arith.muli %arg0, %c1_i32 : i32
    %1 = arith.addi %0, %arg1 : i32
    %2 = arith.index_cast %1 : i32 to index
    %3 = memref.load %arg4[%2] : memref<2xi32, #tpu.memory_space<smem>>
    %c1_i32_0 = arith.constant 1 : i32
    %4 = arith.subi %3, %c1_i32_0 : i32
    %c0_i32 = arith.constant 0 : i32
    %5 = arith.maxsi %4, %c0_i32 : i32
    %6 = arith.minsi %arg2, %5 : i32
    %7 = arith.index_cast %1 : i32 to index
    %8 = memref.load %arg3[%7] : memref<2xi32, #tpu.memory_space<smem>>
    %9 = arith.addi %8, %6 : i32
    %c0_i32_1 = arith.constant 0 : i32
    %c0_i32_2 = arith.constant 0 : i32
    return %c0_i32_1, %9 : i32, i32
  }
  func.func @transform_2(%arg0: i32, %arg1: i32, %arg2: i32, %arg3: memref<2xi32, #tpu.memory_space<smem>>, %arg4: memref<2xi32, #tpu.memory_space<smem>>) -> (i32, i32, i32) {
    %c0_i32 = arith.constant 0 : i32
    %c0_i32_0 = arith.constant 0 : i32
    return %arg0, %c0_i32, %arg1 : i32, i32, i32
  }
}

</mosaic_0001>

<bundles_post_ra>
// kernel: tpu_custom_call.1
= control target key start
LH: loop header
LB: loop body
LE: loop exit
PB: predicated region body
PF: predicated region fallthrough
CT: control target
= control target key end

     0   :  { %s4942_s0 = inlined_call_operand.vmem [shape: s32[2], index: 0, kind: input, shape index: {}]   ;;  %s4943_s2 = inlined_call_operand.vmem [shape: s32[128,1], index: 2, kind: input, shape index: {}]   ;;  %s4944_s3 = inlined_call_operand.vmem [shape: f32[8,128], index: 3, kind: input, shape index: {}]   ;;  %s4945_s4 = inlined_call_operand.hbm [shape: f32[2,4,512], index: 4, kind: output, shape index: {}]   ;;  %s4946_s1 = inlined_call_operand.vmem [shape: s32[2], index: 1, kind: input, shape index: {}]  }
   0x1   :  { %s9_s17 = sshll.u32 %s4942_s0, 4  ;;  %s13_s20 = sshll.u32 %s4946_s1, 4  ;;  %s10_s17 = int_to_ptr.vmem [resolvable:$true] %s9_s17  ;;  %s14_s20 = int_to_ptr.vmem [resolvable:$true] %s13_s20 }
   0x2   :  { %s2849_s21 = scalar_lea.vmem %s10_s17, 16  ;;  %p2854_p1 = scmp.lt.s32.totalorder %s10_s17, %s10_s17 }
   0x3   :  { %p2850_p0 = scmp.ne.s32.totalorder %s10_s17, %s2849_s21  ;;  %p2855_p2 = scmp.lt.s32.totalorder %s2849_s21, %s2849_s21 }
   0x5   :  { %p2856_p3 = por %p2855_p2, %p2854_p1 }
   0x7   :  { %p2857_p4 = pnand %p2856_p3, %p2850_p0 }
   0x9   :  { %2860 = shalt.err (!%p2857_p4)  }
   0xa   :  { %s2953_s22 = smov [#allocation4]   ;;  %s2861_s23 = scalar_lea.vmem %s14_s20, 16 }
   0xb   :  { %12 = dma.vmem_to_smem %s10_s17, 16, %s2953_s22, [#allocation3] }
   0xc   :  { %p2862_p5 = scmp.ne.s32.totalorder %s14_s20, %s2861_s23  ;;  %p2866_p6 = scmp.lt.s32.totalorder %s14_s20, %s14_s20 }
   0xd   :  { %p2867_p7 = scmp.lt.s32.totalorder %s2861_s23, %s2861_s23 }
   0xf   :  { %p2868_p8 = por %p2867_p7, %p2866_p6 }
  0x11   :  { %p2869_p9 = pnand %p2868_p8, %p2862_p5 }
  0x13   :  { %2872 = shalt.err (!%p2869_p9)  }
  0x14   :  { %s2954_s0 = smov [#allocation5]  }
  0x15   :  { %16 = dma.vmem_to_smem %s14_s20, 16, %s2954_s0, [#allocation3] }
  0x16   :  { %2923 = dma.done.wait [#allocation3], 32 }
  0x17   :  { %2924 = vsyncadd [#allocation3], 4294967264 }
  0x18   :  { %18 = sfence }
  0x19   :  { %19 = vsyncpa [#allocation7], 0 }
  0x1a   :  { %21 = vsyncpa [#allocation7 + $0x1], 0  ;;  %s2991_s1 = smov 0   ;;  %s2993_s24 = smov 0  }
  0x1b   :  { %s2995_s25 = smov 0   ;;  %s2997_s26 = smov 0  }
  0x1c   :  { %s2999_s27 = smov 0   ;;  %s3001_s28 = smov 0  }
  0x1d LB: > { %s2474_s29 = sadd.s32 4294967295, %s2951_s28   ;;  %s2475_s30 = sadd.s32 4294967294, %s2951_s28   ;;  %s2951_s28 = sphi %s3001_s28, %s27_s28   ;;  %s2947_s27 = sphi %s2999_s27, %s5300_s27   ;;  %s2943_s26 = sphi %s2997_s26, %s5299_s26   ;;  %s2939_s25 = sphi %s2995_s25, %s5298_s25   ;;  %s2935_s24 = sphi %s2993_s24, %s5297_s24   ;;  %s2931_s1 = sphi %s2991_s1, %s5296_s1  }
  0x1e   : > { %s46_s5 = sadd.s32 1, %s2947_s27  ;;  %s143_s6 = sadd.s32 1, %s2939_s25 }
  0x1f   : > { %p48_p10 = scmp.ge.s32.totalorder %s46_s5, 2  ;;  %p153_p11 = scmp.ne.s32.totalorder %s2939_s25, %s2935_s24 }
  0x20   : > { %p154_p12 = scmp.eq.s32.totalorder %s2474_s29, 1  ;;  %p159_p13 = scmp.ne.s32.totalorder %s2935_s24, %s2931_s1 }
  0x21   : > { %s5302_s5 = smov (%p48_p10, %s46_s5), 0  ;;  %p160_p1 = scmp.eq.s32.totalorder %s2475_s30, 1 }
  0x22   : > { %p3031_p0 = por %p154_p12, %p153_p11  ;;  %s138_s8 = ssub.s32 %s2947_s27, %s5302_s5 }
  0x23   : > { %p2486_p2 = scmp.ge.s32.totalorder %s2951_s28, 1  ;;  %p141_p3 = scmp.eq.s32.totalorder %s138_s8, 0 }
  0x24   : > { %p3038_p4 = por %p160_p1, %p159_p13  ;;  %p230_p5 = scmp.lt.s32.totalorder %s2951_s28, 3 }
  0x25   : > { %s3044_s10 = scalar_select %p141_p3, %s2939_s25, %s143_s6  }
  0x26   : > { %p231_p6 = pnand %p2486_p2, %p230_p5 }
  0x27   : > { %s271_s11 = sand.u32 (!%p231_p6), 1, %s2935_s24   ;;  %s275_s12 = sld [smem:[#allocation5 + %s2943_s26]] (!%p231_p6) }
  0x28   : > { %234 = sbr.rel (%p231_p6) target bundleno = 650 (0x28a), region = 28  ;;  %s3050_s13 = sshll.u32 (!%p231_p6), %s271_s11, 4 }
  0x29   : > { %s299_s14 = sld [smem:[#allocation5 + %s2943_s26]] (!%p231_p6) }
  0x2a   : > { %s330_s15 = sld [smem:[#allocation5 + %s2943_s26]] (!%p231_p6) }
  0x2b   : > { %s281_s16 = sld [smem:[#allocation4 + %s2943_s26]] (!%p231_p6) }
  0x2c   : > { %s305_s19 = sld [smem:[#allocation4 + %s2943_s26]] (!%p231_p6) }
  0x2d   : > { %v2955_v0 = vmov 0.0   ;;  %s2488_s17 = sadd.s32 4294967295, %s275_s12 }
  0x2e   : > { %326 = vst [vmem:[#allocation2 + $0x10] sm:$0xff] %v2955_v0  ;;  %327 = vst [vmem:[#allocation2] sm:$0xff] %v2955_v0  ;;  %p277_p7 = scmp.gt.s32.totalorder %s2488_s17, 0 }
  0x2f   : > { %328 = vst [vmem:[#allocation2 + $0x18] sm:$0xff] %v2955_v0  ;;  %329 = vst [vmem:[#allocation2 + $0x8] sm:$0xff] %v2955_v0  ;;  %s2492_s18 = sadd.s32 4294967295, %s299_s14 }
  0x30   : > { %s5304_s17 = smov (!%p277_p7, %s2488_s17), 0  ;;  %p301_p8 = scmp.gt.s32.totalorder %s2492_s18, 0 }
  0x31   : > { %s5306_s17 = smov (%p277_p7, %s5304_s17), 0  ;;  %p2496_p11 = scmp.le.s32.totalorder %s330_s15, 0 }
  0x32   : > { %s5308_s18 = smov (!%p301_p8, %s2492_s18), 0  ;;  %s282_s20 = sadd.s32 %s281_s16, %s5306_s17 }
  0x33   : > { %s2490_s21 = sshll.u32 %s282_s20, 4  ;;  %s5310_s18 = smov (%p301_p8, %s5308_s18), 0 }
  0x34   : > { %p284_p9 = scmp.lt.s32.totalorder %s2490_s21, 15  ;;  %s306_s22 = sadd.s32 %s305_s19, %s5310_s18 }
  0x35   : > { %p307_p10 = scmp.lt.s32.totalorder %s306_s22, 0  ;;  %s3067_s16 = scalar_lea.vmem [#allocation6], %s3050_s13 }
  0x36   : > { %s5312_s21 = smov (!%p284_p9, %s2490_s21), 15  ;;  %334 = sbr.rel (%p2496_p11) target bundleno = 608 (0x260), region = 36 }
  0x37   : > { %s2491_s23 = sshll.u32 %s5312_s21, 3  ;;  %s5314_s22 = smov (!%p307_p10, %s306_s22), 0 }
  0x38   : > { %s3059_s30 = scalar_lea.vmem %s4943_s2, %s2491_s23  ;;  %s2494_s6 = sshll.u32 %s5314_s22, 3 }
  0x39   : > { %s3064_s14 = scalar_lea.vmem %s4944_s3, %s2494_s6 }
  0x3b   : > { %v363_v1 = vld [vmem:[%s3059_s30 + $0x78] sm:$0xff]  ;;  %v361_v2 = vld [vmem:[%s3059_s30 + $0x68] sm:$0xff]  ;;  %v338_v3 = vlaneseq  ;;  %v2956_v4 = vmov 0   ;;  %s2497_s17 = sshll.u32 %s2943_s26, 9  ;;  %v362_v6 = vld [vmem:[%s3059_s30 + $0x70] sm:$0xff]  ;;  %v4988_v8 = vmov 0.0  }
  0x3c   : > { %2840 = vset.pattern.permute.xlu1 %v2956_v4  ;;  %2839 = vset.pattern.permute.xlu0 %v2956_v4  ;;  %v360_v7 = vld [vmem:[%s3059_s30 + $0x60] sm:$0xff]  ;;  %v343_v9 = vstv %s2497_s17  ;;  %v359_v11 = vld [vmem:[%s3059_s30 + $0x58] sm:$0xff]  ;;  %v358_v12 = vld [vmem:[%s3059_s30 + $0x50] sm:$0xff]  ;;  %v4980_v35 = vmov 1.0  }
  0x3d   : > { %410 = vperm.xlu0 %2839, %v363_v1   ;;  %404 = vperm.xlu1 %2840, %v361_v2   ;;  %v339_v5 = vand.u32 127, %v338_v3  ;;  %v357_v14 = vld [vmem:[%s3059_s30 + $0x48] sm:$0xff]  ;;  %v356_v15 = vld [vmem:[%s3059_s30 + $0x40] sm:$0xff]  ;;  %v355_v18 = vld [vmem:[%s3059_s30 + $0x38] sm:$0xff] }
  0x3e   : > { %705 = vmatprep.mubr.f32.mxu0 %v4988_v8  ;;  %941 = vmatprep.mubr.f32.mxu1 %v4988_v8  ;;  %v354_v19 = vld [vmem:[%s3059_s30 + $0x30] sm:$0xff]  ;;  %v353_v20 = vld [vmem:[%s3059_s30 + $0x28] sm:$0xff]  ;;  %v352_v21 = vld [vmem:[%s3059_s30 + $0x20] sm:$0xff] }
  0x3f   : > { %v341_v10 = vadd.s32 256, %v339_v5  ;;  %v342_v16 = vadd.s32 384, %v339_v5  ;;  %v351_v22 = vld [vmem:[%s3059_s30 + $0x18] sm:$0xff]  ;;  %v350_v23 = vld [vmem:[%s3059_s30 + $0x10] sm:$0xff]  ;;  %v349_v24 = vld [vmem:[%s3059_s30 + $0x8] sm:$0xff]  ;;  %v340_v28 = vadd.s32 128, %v339_v5  ;;  %v3100_v31 = vadd.s32 %v343_v9, %v339_v5 }
  0x40   : > { %v348_v25 = vld [vmem:[%s3059_s30] sm:$0xff] }
  0x41   : > { %407 = vperm.xlu0 %2839, %v362_v6   ;;  %401 = vperm.xlu1 %2840, %v360_v7   ;;  %v3078_v13 = vadd.s32 %v343_v9, %v341_v10  ;;  %v3082_v17 = vadd.s32 %v343_v9, %v342_v16  ;;  %v608_v26 = vld [vmem:[%s3064_s14] sm:$0xff]  ;;  %v3098_v30 = vadd.s32 %v343_v9, %v340_v28 }
  0x42   : > { %v3093_v27 = vand.u32 4294901760, %v608_v26 }
  0x44   : > { %v3096_v29 = vsub.f32 %v608_v26, %v3093_v27 }
  0x45   : > { %398 = vperm.xlu0 %2839, %v359_v11   ;;  %395 = vperm.xlu1 %2840, %v358_v12  }
  0x46   : > { %5042 = vst [vmem:[#allocation10_spill] sm:$0xff] %v3096_v29  ;;  %v3103_v32 = vand.u32 4294901760, %v3096_v29 }
  0x48   : > { %5043 = vst [vmem:[#allocation11_spill] sm:$0xff] %v3103_v32  ;;  %v709_v38 = vsub.f32 %v3096_v29, %v3103_v32  ;;  %v5051_v32 = vmov 1.0  }
  0x49   : > { %392 = vperm.xlu0 %2839, %v357_v14   ;;  %389 = vperm.xlu1 %2840, %v356_v15  }
  0x4a   : > { %v3179_v47 = vand.u32 4294901760, %v709_v38 }
  0x4c   : > { %5044 = vst [vmem:[#allocation12_spill] sm:$0xff] %v3179_v47 }
  0x4d   : > { %386 = vperm.xlu0 %2839, %v355_v18   ;;  %383 = vperm.xlu1 %2840, %v354_v19  }
  0x51   : > { %380 = vperm.xlu0 %2839, %v353_v20   ;;  %377 = vperm.xlu1 %2840, %v352_v21  }
  0x55   : > { %374 = vperm.xlu0 %2839, %v351_v22   ;;  %371 = vperm.xlu1 %2840, %v350_v23  }
  0x59   : > { %368 = vperm.xlu0 %2839, %v349_v24   ;;  %365 = vperm.xlu1 %2840, %v348_v25  }
  0xb8   : > { %v3105_v33 = vpop.permute.xlu0 %410  ;;  %v3107_v34 = vpop.permute.xlu1 %404 }
  0xb9   : > { %vm473_vm0 = vcmp.eq.s32.totalorder %v3105_v33, %v3098_v30  ;;  %vm472_vm1 = vcmp.eq.s32.totalorder %v3105_v33, %v3100_v31  ;;  %vm465_vm2 = vcmp.eq.s32.totalorder %v3107_v34, %v3098_v30  ;;  %vm464_vm3 = vcmp.eq.s32.totalorder %v3107_v34, %v3100_v31 }
  0xba   : > { %2562 = vmatprep.subr.msk.mxu0 %vm473_vm0, %v4980_v35  ;;  %v2559_v36 = vsel %vm473_vm0, 1.0, %v4988_v8  ;;  %v2558_v37 = vsel %vm472_vm1, 1.0, %v4988_v8  ;;  %v2551_v39 = vsel %vm465_vm2, 1.0, %v4988_v8  ;;  %v2550_v40 = vsel %vm464_vm3, 1.0, %v4988_v8 }
  0xbb   : > { %2563 = vmatpush1.msk.msra.mxu0 %vm472_vm1, %v4980_v35  ;;  %v3143_v41 = vsub.f32 %v2559_v36, %v2559_v36  ;;  %v3145_v42 = vsub.f32 %v2558_v37, %v2558_v37  ;;  %v3185_v48 = vsub.f32 %v2551_v39, %v2551_v39  ;;  %v3187_v49 = vsub.f32 %v2550_v40, %v2550_v40 }
  0xbc   : > { %v3147_v43 = vpop.permute.xlu0 %407  ;;  %v3149_v44 = vpop.permute.xlu1 %401 }
  0xbd   : > { %vm469_vm8 = vcmp.eq.s32.totalorder %v3147_v43, %v3098_v30  ;;  %vm468_vm9 = vcmp.eq.s32.totalorder %v3147_v43, %v3100_v31  ;;  %vm461_vm10 = vcmp.eq.s32.totalorder %v3149_v44, %v3098_v30  ;;  %vm460_vm11 = vcmp.eq.s32.totalorder %v3149_v44, %v3100_v31 }
  0xbe   : > { %v2555_v45 = vsel %vm469_vm8, 1.0, %v4988_v8  ;;  %2564 = vmatprep.subr.msk.mxu0 %vm469_vm8, %v4980_v35  ;;  %v2554_v46 = vsel %vm468_vm9, 1.0, %v4988_v8  ;;  %v2547_v50 = vsel %vm461_vm10, 1.0, %v4988_v8  ;;  %v2546_v51 = vsel %vm460_vm11, 1.0, %v4988_v8 }
  0xbf   : > { %2565 = vmatpush1.msk.msra.mxu0 %vm468_vm9, %v4980_v35  ;;  %v3197_v52 = vsub.f32 %v2555_v45, %v2555_v45  ;;  %v3199_v53 = vsub.f32 %v2554_v46, %v2554_v46  ;;  %v4979_v56 = vand.u32 4294901760, %v3143_v41  ;;  %v4978_v57 = vand.u32 4294901760, %v3145_v42 }
  0xc0   : > { %v3201_v54 = vpop.permute.xlu0 %398  ;;  %v3203_v55 = vpop.permute.xlu1 %395  ;;  %2566 = vmatprep.subr.msk.mxu0 %vm465_vm2, %v4980_v35  ;;  %v3227_v58 = vsub.f32 %v2547_v50, %v2547_v50  ;;  %v3229_v59 = vsub.f32 %v2546_v51, %v2546_v51  ;;  %v4966_v0 = vand.u32 4294901760, %v3185_v48  ;;  %v4965_v1 = vand.u32 4294901760, %v3187_v49 }
  0xc1   : > { %2567 = vmatpush1.msk.msra.mxu0 %vm464_vm3, %v4980_v35  ;;  %vm457_vm12 = vcmp.eq.s32.totalorder %v3201_v54, %v3098_v30  ;;  %vm456_vm13 = vcmp.eq.s32.totalorder %v3201_v54, %v3100_v31  ;;  %vm453_vm14 = vcmp.eq.s32.totalorder %v3203_v55, %v3098_v30  ;;  %vm5014_vm15 = vcmp.eq.s32.totalorder %v3203_v55, %v3100_v31 }
  0xc2   : > { %2568 = vmatprep.subr.msk.mxu0 %vm461_vm10, %v4980_v35  ;;  %v720_v60 = vsub.f32 %v3143_v41, %v4979_v56  ;;  %v726_v61 = vsub.f32 %v3145_v42, %v4978_v57  ;;  %v2543_v62 = vsel %vm457_vm12, 1.0, %v4988_v8  ;;  %v2542_v63 = vsel %vm456_vm13, 1.0, %v4988_v8 }
  0xc3   : > { %2569 = vmatpush1.msk.msra.mxu0 %vm460_vm11, %v4980_v35  ;;  %v2539_v6 = vsel %vm453_vm14, 1.0, %v4988_v8  ;;  %v2538_v7 = vsel %vm5014_vm15, 1.0, %v4988_v8  ;;  %v4973_v9 = vand.u32 4294901760, %v3197_v52  ;;  %v4972_v10 = vand.u32 4294901760, %v3199_v53 }
  0xc4   : > { %v721_v2 = vand.u32 4294901760, %v720_v60  ;;  %v3251_v3 = vpop.permute.xlu0 %392  ;;  %v3253_v4 = vpop.permute.xlu1 %389  ;;  %2570 = vmatprep.subr.msk.mxu0 %vm457_vm12, %v4980_v35  ;;  %v727_v5 = vand.u32 4294901760, %v726_v61  ;;  %v3277_v11 = vsub.f32 %v2543_v62, %v2543_v62  ;;  %v3279_v12 = vsub.f32 %v2542_v63, %v2542_v63 }
  0xc5   : > { %2571 = vmatpush1.msk.msra.mxu0 %vm456_vm13, %v4980_v35  ;;  %vm4947_vm7 = vcmp.eq.s32.totalorder %v3251_v3, %v3098_v30  ;;  %vm5013_vm6 = vcmp.eq.s32.totalorder %v3251_v3, %v3100_v31  ;;  %vm4948_vm5 = vcmp.eq.s32.totalorder %v3253_v4, %v3098_v30  ;;  %v732_v15 = vsub.f32 %v3197_v52, %v4973_v9 }
  0xc6   : > { %722 = vmatprep.subr.mxu1 %v721_v2  ;;  %2572 = vmatprep.subr.msk.mxu0 %vm453_vm14, %v4980_v35  ;;  %v2535_v14 = vsel %vm4947_vm7, 1.0, %v4988_v8  ;;  %v738_v16 = vsub.f32 %v3199_v53, %v4972_v10  ;;  %v2534_v18 = vsel %vm5013_vm6, 1.0, %v4988_v8  ;;  %v744_v19 = vsub.f32 %v3185_v48, %v4966_v0 }
  0xc7   : > { %728 = vmatpush1.msra.mxu1 %v727_v5  ;;  %2573 = vmatpush1.msk.msra.mxu0 %vm5014_vm15, %v4980_v35  ;;  %v3308_v20 = vsub.f32 %v2539_v6, %v2539_v6  ;;  %v3310_v21 = vsub.f32 %v2538_v7, %v2538_v7  ;;  %v2531_v24 = vsel %vm4948_vm5, 1.0, %v4988_v8  ;;  %v750_v25 = vsub.f32 %v3187_v49, %v4965_v1 }
  0xc8   : > { %v3312_v22 = vpop.permute.xlu0 %386  ;;  %v3314_v23 = vpop.permute.xlu1 %383  ;;  %2574 = vmatprep.subr.msk.mxu0 %vm4947_vm7, %v4980_v35  ;;  %v733_v26 = vand.u32 4294901760, %v732_v15  ;;  %v739_v28 = vand.u32 4294901760, %v738_v16  ;;  %vm4949_vm4 = vcmp.eq.s32.totalorder %v3253_v4, %v3100_v31  ;;  %v4964_v36 = vand.u32 4294901760, %v3227_v58 }
  0xc9   : > { %2575 = vmatpush1.msk.msra.mxu0 %vm5013_vm6, %v4980_v35  ;;  %v3334_v37 = vsub.f32 %v2535_v14, %v2535_v14  ;;  %v3336_v38 = vsub.f32 %v2534_v18, %v2534_v18  ;;  %vm4950_vm7 = vcmp.eq.s32.totalorder %v3312_v22, %v3098_v30  ;;  %v4960_v39 = vand.u32 4294901760, %v3229_v59 }
  0xca   : > { %2576 = vmatprep.subr.msk.mxu0 %vm4948_vm5, %v4980_v35  ;;  %734 = vmatprep.subr.mxu1 %v733_v26  ;;  %v745_v40 = vand.u32 4294901760, %v744_v19  ;;  %v3345_v45 = vsub.f32 %v2531_v24, %v2531_v24  ;;  %v756_v46 = vsub.f32 %v3227_v58, %v4964_v36  ;;  %vm4952_vm5 = vcmp.eq.s32.totalorder %v3312_v22, %v3100_v31 }
  0xcb   : > { %2577 = vmatpush1.msk.msra.mxu0 %vm4949_vm4, %v4980_v35  ;;  %740 = vmatpush1.msra.mxu1 %v739_v28  ;;  %v751_v50 = vand.u32 4294901760, %v750_v25  ;;  %v2530_v51 = vsel %vm4949_vm4, 1.0, %v4988_v8  ;;  %v762_v62 = vsub.f32 %v3229_v59, %v4960_v39  ;;  %v4959_v63 = vand.u32 4294901760, %v3277_v11 }
  0xcc   : > { %v3360_v60 = vpop.permute.xlu0 %380  ;;  %v3362_v61 = vpop.permute.xlu1 %377  ;;  %2578 = vmatprep.subr.msk.mxu0 %vm4950_vm7, %v4980_v35  ;;  %746 = vmatprep.subr.mxu1 %v745_v40  ;;  %v757_v2 = vand.u32 4294901760, %v756_v46  ;;  %v2527_v5 = vsel %vm4950_vm7, 1.0, %v4988_v8  ;;  %vm4951_vm4 = vcmp.eq.s32.totalorder %v3314_v23, %v3098_v30  ;;  %v4958_v6 = vand.u32 4294901760, %v3279_v12 }
  0xcd   : > { %5045 = vst [vmem:[#allocation13_spill] sm:$0xff] %v3360_v60  ;;  %5046 = vst [vmem:[#allocation14_spill] sm:$0xff] %v3362_v61  ;;  %2579 = vmatpush1.msk.msra.mxu0 %vm4952_vm5, %v4980_v35  ;;  %752 = vmatpush1.msra.mxu1 %v751_v50  ;;  %v763_v7 = vand.u32 4294901760, %v762_v62  ;;  %v2526_v14 = vsel %vm4952_vm5, 1.0, %v4988_v8  ;;  %v768_v15 = vsub.f32 %v3277_v11, %v4959_v63  ;;  %v2523_v18 = vsel %vm4951_vm4, 1.0, %v4988_v8 }
  0xce   : > { %2580 = vmatprep.subr.msk.mxu0 %vm4951_vm4, %v4980_v35  ;;  %vm4953_vm7 = vcmp.eq.s32.totalorder %v3314_v23, %v3100_v31  ;;  %v3396_v16 = vsub.f32 %v2530_v51, %v2530_v51  ;;  %758 = vmatprep.subr.mxu1 %v757_v2  ;;  %v774_v19 = vsub.f32 %v3279_v12, %v4958_v6  ;;  %v4956_v24 = vand.u32 4294901760, %v3308_v20 }
  0xcf   : > { %2581 = vmatpush1.msk.msra.mxu0 %vm4953_vm7, %v4980_v35  ;;  %v3410_v25 = vsub.f32 %v2527_v5, %v2527_v5  ;;  %764 = vmatpush1.msra.mxu1 %v763_v7  ;;  %v769_v26 = vand.u32 4294901760, %v768_v15  ;;  %vm4955_vm4 = vcmp.eq.s32.totalorder %v3360_v60, %v3098_v30  ;;  %v4954_v46 = vand.u32 4294901760, %v3310_v21 }
  0xd0   : > { %v3412_v28 = vpop.permute.xlu0 %374  ;;  %v3414_v40 = vpop.permute.xlu1 %371  ;;  %v3419_v50 = vsub.f32 %v2526_v14, %v2526_v14  ;;  %v775_v51 = vand.u32 4294901760, %v774_v19  ;;  %v780_v62 = vsub.f32 %v3308_v20, %v4956_v24  ;;  %2582 = vmatprep.subr.msk.mxu0 %vm4955_vm4, %v4980_v35  ;;  %vm4962_vm5 = vcmp.eq.s32.totalorder %v3360_v60, %v3100_v31 }
  0xd1   : > { %5047 = vst [vmem:[#allocation15_spill] sm:$0xff] %v3412_v28  ;;  %5048 = vst [vmem:[#allocation16_spill] sm:$0xff] %v3414_v40  ;;  %770 = vmatprep.subr.mxu1 %v769_v26  ;;  %v3430_v2 = vsub.f32 %v2523_v18, %v2523_v18  ;;  %v2522_v5 = vsel %vm4953_vm7, 1.0, %v4988_v8  ;;  %v786_v7 = vsub.f32 %v3310_v21, %v4954_v46  ;;  %2583 = vmatpush1.msk.msra.mxu0 %vm4962_vm5, %v4980_v35 }
  0xd2   : > { %v4957_v14 = vand.u32 4294901760, %v3334_v37  ;;  %776 = vmatpush1.msra.mxu1 %v775_v51  ;;  %v781_v15 = vand.u32 4294901760, %v780_v62  ;;  %v2519_v18 = vsel %vm4955_vm4, 1.0, %v4988_v8  ;;  %vm4961_vm7 = vcmp.eq.s32.totalorder %v3362_v61, %v3098_v30 }
  0xd3   : > { %v4963_v19 = vand.u32 4294901760, %v3336_v38  ;;  %v787_v26 = vand.u32 4294901760, %v786_v7  ;;  %v2518_v46 = vsel %vm4962_vm5, 1.0, %v4988_v8  ;;  %2584 = vmatprep.subr.msk.mxu0 %vm4961_vm7, %v4980_v35  ;;  %vm5012_vm4 = vcmp.eq.s32.totalorder %v3362_v61, %v3100_v31 }
  0xd4   : > { %v792_v51 = vsub.f32 %v3334_v37, %v4957_v14  ;;  %v3464_v62 = vpop.permute.xlu0 %368  ;;  %v3466_v7 = vpop.permute.xlu1 %365  ;;  %782 = vmatprep.subr.mxu1 %v781_v15  ;;  %v2515_v24 = vsel %vm4961_vm7, 1.0, %v4988_v8  ;;  %v2514_v6 = vsel %vm5012_vm4, 1.0, %v4988_v8  ;;  %2585 = vmatpush1.msk.msra.mxu0 %vm5012_vm4, %v4980_v35  ;;  %v4969_v15 = vand.u32 4294901760, %v3345_v45 }
  0xd5   : > { %5049 = vst [vmem:[#allocation17_spill] sm:$0xff] %v3464_v62  ;;  %5050 = vst [vmem:[#allocation18_spill] sm:$0xff] %v3466_v7  ;;  %v798_v14 = vsub.f32 %v3336_v38, %v4963_v19  ;;  %v3484_v63 = vsub.f32 %v2522_v5, %v2522_v5  ;;  %788 = vmatpush1.msra.mxu1 %v787_v26  ;;  %v3490_v19 = vsub.f32 %v2519_v18, %v2519_v18 }
  0xd6   : > { %v793_v39 = vand.u32 4294901760, %v792_v51  ;;  %v3492_v36 = vsub.f32 %v2518_v46, %v2518_v46  ;;  %v804_v0 = vsub.f32 %v3345_v45, %v4969_v15  ;;  %v3497_v5 = vsub.f32 %v2515_v24, %v2515_v24 }
  0xd7   : > { %v799_v1 = vand.u32 4294901760, %v798_v14  ;;  %v3499_v26 = vsub.f32 %v2514_v6, %v2514_v6  ;;  %vm4967_vm7 = vcmp.eq.s32.totalorder %v3412_v28, %v3098_v30  ;;  %v4968_v51 = vand.u32 4294901760, %v3396_v16 }
  0xd8   : > { %794 = vmatprep.subr.mxu1 %v793_v39  ;;  %v805_v18 = vand.u32 4294901760, %v804_v0  ;;  %v2511_v46 = vsel %vm4967_vm7, 1.0, %v4988_v8  ;;  %2586 = vmatprep.subr.msk.mxu0 %vm4967_vm7, %v4980_v35  ;;  %vm4970_vm5 = vcmp.eq.s32.totalorder %v3412_v28, %v3100_v31  ;;  %v4971_v39 = vand.u32 4294901760, %v3410_v25 }
  0xd9   : > { %800 = vmatpush1.msra.mxu1 %v799_v1  ;;  %v3515_v6 = vsub.f32 %v2511_v46, %v2511_v46  ;;  %v810_v0 = vsub.f32 %v3396_v16, %v4968_v51  ;;  %v2510_v1 = vsel %vm4970_vm5, 1.0, %v4988_v8  ;;  %2587 = vmatpush1.msk.msra.mxu0 %vm4970_vm5, %v4980_v35  ;;  %vm4974_vm7 = vcmp.eq.s32.totalorder %v3414_v40, %v3098_v30 }
  0xda   : > { %806 = vmatprep.subr.mxu1 %v805_v18  ;;  %v3530_v24 = vsub.f32 %v2510_v1, %v2510_v1  ;;  %v816_v14 = vsub.f32 %v3410_v25, %v4971_v39  ;;  %v2507_v46 = vsel %vm4974_vm7, 1.0, %v4988_v8  ;;  %2588 = vmatprep.subr.msk.mxu0 %vm4974_vm7, %v4980_v35  ;;  %v4975_v51 = vand.u32 4294901760, %v3419_v50 }
  0xdb   : > { %v811_v15 = vand.u32 4294901760, %v810_v0  ;;  %v3544_v18 = vsub.f32 %v2507_v46, %v2507_v46  ;;  %vm4976_vm5 = vcmp.eq.s32.totalorder %v3414_v40, %v3100_v31  ;;  %v4977_v1 = vand.u32 4294901760, %v3430_v2 }
  0xdc   : > { %v817_v39 = vand.u32 4294901760, %v816_v14  ;;  %v822_v10 = vsub.f32 %v3419_v50, %v4975_v51  ;;  %v2506_v9 = vsel %vm4976_vm5, 1.0, %v4988_v8  ;;  %2589 = vmatpush1.msk.msra.mxu0 %vm4976_vm5, %v4980_v35  ;;  %vm4984_vm7 = vcmp.eq.s32.totalorder %v3464_v62, %v3098_v30 }
  0xdd   : > { %812 = vmatpush1.msra.mxu1 %v811_v15  ;;  %v3562_v0 = vsub.f32 %v2506_v9, %v2506_v9  ;;  %v828_v14 = vsub.f32 %v3430_v2, %v4977_v1  ;;  %v2503_v46 = vsel %vm4984_vm7, 1.0, %v4988_v8  ;;  %2590 = vmatprep.subr.msk.mxu0 %vm4984_vm7, %v4980_v35  ;;  %v4987_v51 = vand.u32 4294901760, %v3484_v63 }
  0xde   : > { %818 = vmatprep.subr.mxu1 %v817_v39  ;;  %v823_v15 = vand.u32 4294901760, %v822_v10  ;;  %v3576_v9 = vsub.f32 %v2503_v46, %v2503_v46  ;;  %vm4985_vm5 = vcmp.eq.s32.totalorder %v3464_v62, %v3100_v31  ;;  %v4986_v1 = vand.u32 4294901760, %v3490_v19 }
  0xdf   : > { %v829_v57 = vand.u32 4294901760, %v828_v14  ;;  %v834_v56 = vsub.f32 %v3484_v63, %v4987_v51  ;;  %v2502_v35 = vsel %vm4985_vm5, 1.0, %v4988_v8  ;;  %2591 = vmatpush1.msk.msra.mxu0 %vm4985_vm5, %v5051_v32  ;;  %vm5011_vm7 = vcmp.eq.s32.totalorder %v3466_v7, %v3098_v30 }
  0xe0   : > { %824 = vmatpush1.msra.mxu1 %v823_v15  ;;  %v3594_v10 = vsub.f32 %v2502_v35, %v2502_v35  ;;  %v840_v39 = vsub.f32 %v3490_v19, %v4986_v1  ;;  %v2499_v14 = vsel %vm5011_vm7, 1.0, %v4988_v8  ;;  %2592 = vmatprep.subr.msk.mxu0 %vm5011_vm7, %v5051_v32  ;;  %v4994_v46 = vand.u32 4294901760, %v3492_v36 }
  0xe1   : > { %830 = vmatprep.subr.mxu1 %v829_v57  ;;  %v835_v15 = vand.u32 4294901760, %v834_v56  ;;  %v3608_v35 = vsub.f32 %v2499_v14, %v2499_v14  ;;  %vm5010_vm5 = vcmp.eq.s32.totalorder %v3466_v7, %v3100_v31  ;;  %v5001_v1 = vand.u32 4294901760, %v3497_v5 }
  0xe2   : > { %v841_v51 = vand.u32 4294901760, %v840_v39  ;;  %v846_v8 = vsub.f32 %v3492_v36, %v4994_v46  ;;  %v5052_v62 = vmov 0.0   ;;  %2593 = vmatpush1.msk.msra.mxu0 %vm5010_vm5, %v5051_v32  ;;  %v5002_v56 = vand.u32 4294901760, %v3499_v26 }
  0xe3   : > { %v2498_v40 = vsel %vm5010_vm5, 1.0, %v5052_v62  ;;  %836 = vmatpush1.msra.mxu1 %v835_v15  ;;  %v852_v39 = vsub.f32 %v3497_v5, %v5001_v1  ;;  %951 = vmatprep.subr.mxu0 %v3143_v41  ;;  %v5003_v14 = vand.u32 4294901760, %v3515_v6  ;;  %v5005_v46 = vand.u32 4294901760, %v3530_v24 }
  0xe4   : > { %v3625_v57 = vsub.f32 %v2498_v40, %v2498_v40  ;;  %842 = vmatprep.subr.mxu1 %v841_v51  ;;  %v847_v28 = vand.u32 4294901760, %v846_v8  ;;  %v858_v7 = vsub.f32 %v3499_v26, %v5002_v56  ;;  %711 = vmatmul.mubr.f32.vlgmr.msra.gmra.mxu0 %v3179_v47  ;;  %v5008_v40 = vand.u32 4294901760, %v3544_v18 }
  0xe5   : > { %v5007_v15 = vand.u32 4294901760, %v3562_v0  ;;  %v853_v29 = vand.u32 4294901760, %v852_v39  ;;  %v864_v1 = vsub.f32 %v3515_v6, %v5003_v14  ;;  %954 = vmatpush1.msra.mxu0 %v3145_v42  ;;  %v870_v8 = vsub.f32 %v3530_v24, %v5005_v46  ;;  %1077 = vmatprep.mubr.f32.mxu0 %v5052_v62 }
  0xe6   : > { %v5009_v51 = vand.u32 4294901760, %v3576_v9  ;;  %848 = vmatpush1.msra.mxu1 %v847_v28  ;;  %v859_v56 = vand.u32 4294901760, %v858_v7  ;;  %957 = vmatprep.subr.mxu0 %v3197_v52  ;;  %v876_v39 = vsub.f32 %v3544_v18, %v5008_v40  ;;  %v893_v47 = vand.u32 4294901760, %v3594_v10 }
  0xe7   : > { %v882_v14 = vsub.f32 %v3562_v0, %v5007_v15  ;;  %854 = vmatprep.subr.mxu1 %v853_v29  ;;  %v865_v46 = vand.u32 4294901760, %v864_v1  ;;  %960 = vmatpush1.msra.mxu0 %v3199_v53  ;;  %v899_v7 = vand.u32 4294901760, %v3608_v35  ;;  %v871_v62 = vand.u32 4294901760, %v870_v8 }
  0xe8   : > { %v888_v28 = vsub.f32 %v3576_v9, %v5009_v51  ;;  %860 = vmatpush1.msra.mxu1 %v859_v56  ;;  %963 = vmatprep.subr.mxu0 %v3185_v48  ;;  %v894_v15 = vsub.f32 %v3594_v10, %v893_v47  ;;  %v905_v40 = vand.u32 4294901760, %v3625_v57  ;;  %v877_v29 = vand.u32 4294901760, %v876_v39  ;;  %v5065_v39 = vld [vmem:[#allocation15_spill] sm:$0xff] }
  0xe9   : > { %866 = vmatprep.subr.mxu1 %v865_v46  ;;  %966 = vmatpush1.msra.mxu0 %v3187_v49  ;;  %v900_v1 = vsub.f32 %v3608_v35, %v899_v7  ;;  %v883_v51 = vand.u32 4294901760, %v882_v14  ;;  %vm5053_vm7 = vcmp.eq.s32.totalorder %v3251_v3, %v3098_v30  ;;  %vm5054_vm4 = vcmp.eq.s32.totalorder %v3251_v3, %v3100_v31 }
  0xea   : > { %872 = vmatpush1.msra.mxu1 %v871_v62  ;;  %969 = vmatprep.subr.mxu0 %v3227_v58  ;;  %v906_v56 = vsub.f32 %v3625_v57, %v905_v40  ;;  %v889_v8 = vand.u32 4294901760, %v888_v28  ;;  %v895_v46 = vand.u32 4294901760, %v894_v15  ;;  %vm5057_vm5 = vcmp.eq.s32.totalorder %v3312_v22, %v3098_v30  ;;  %v5062_v15 = vld [vmem:[#allocation10_spill] sm:$0xff] }
  0xeb   : > { %878 = vmatprep.subr.mxu1 %v877_v29  ;;  %972 = vmatpush1.msra.mxu0 %v3229_v59  ;;  %v901_v62 = vand.u32 4294901760, %v900_v1  ;;  %vm5060_vm6 = vcmp.eq.s32.totalorder %v3314_v23, %v3100_v31  ;;  %v5067_v28 = vand.u32 4294901760, %v3145_v42  ;;  %v5071_v29 = vand.u32 4294901760, %v3199_v53  ;;  %v5072_v1 = vld [vmem:[#allocation16_spill] sm:$0xff] }
  0xec   : > { %884 = vmatpush1.msra.mxu1 %v883_v51  ;;  %975 = vmatprep.subr.mxu0 %v3277_v11  ;;  %v907_v14 = vand.u32 4294901760, %v906_v56  ;;  %v5064_v51 = vand.u32 4294901760, %v3143_v41  ;;  %v5069_v41 = vand.u32 4294901760, %v3197_v52  ;;  %v5074_v42 = vand.u32 4294901760, %v3185_v48  ;;  %v5079_v56 = vld [vmem:[#allocation17_spill] sm:$0xff] }
  0xed   : > { %890 = vmatprep.subr.mxu1 %v889_v8  ;;  %978 = vmatpush1.msra.mxu0 %v3279_v12  ;;  %v5076_v52 = vand.u32 4294901760, %v3187_v49  ;;  %v5078_v53 = vand.u32 4294901760, %v3227_v58  ;;  %v5081_v48 = vand.u32 4294901760, %v3229_v59  ;;  %v5082_v49 = vld [vmem:[#allocation18_spill] sm:$0xff]  ;;  %v5084_v58 = vmov 0.0  }
  0xee   : > { %896 = vmatpush1.msra.mxu1 %v895_v46  ;;  %981 = vmatprep.subr.mxu0 %v3308_v20  ;;  %v5086_v8 = vand.u32 4294901760, %v3277_v11  ;;  %v5088_v59 = vand.u32 4294901760, %v3279_v12  ;;  %v5089_v46 = vld [vmem:[#allocation11_spill] sm:$0xff]  ;;  %v5091_v11 = vand.u32 4294901760, %v3310_v21  ;;  %v5092_v12 = vand.u32 4294901760, %v3334_v37 }
  0xef   : > { %902 = vmatprep.subr.mxu1 %v901_v62  ;;  %984 = vmatpush1.msra.mxu0 %v3310_v21  ;;  %v5090_v62 = vand.u32 4294901760, %v3308_v20  ;;  %v5093_v20 = vand.u32 4294901760, %v3336_v38  ;;  %v5094_v21 = vand.u32 4294901760, %v3345_v45 }
  0xf0   : > { %908 = vmatpush1.msra.mxu1 %v907_v14  ;;  %987 = vmatprep.subr.mxu0 %v3334_v37  ;;  %v5095_v37 = vand.u32 4294901760, %v3396_v16  ;;  %v5110_v14 = vand.u32 4294901760, %v3515_v6 }
  0xf1   : > { %943 = vmatmul.mubr.f32.vlgmr.msra.gmra.mxu1 %v3093_v27  ;;  %2594 = vmatprep.subr.msk.mxu1 %vm473_vm0, %v5051_v32 }
  0xf2   : > { %2595 = vmatpush1.msk.msra.mxu1 %vm472_vm1, %v5051_v32  ;;  %990 = vmatpush1.msra.mxu0 %v3336_v38  ;;  %v5096_v38 = vand.u32 4294901760, %v3410_v25 }
  0xf3   : > { %2596 = vmatprep.subr.msk.mxu1 %vm469_vm8, %v5051_v32  ;;  %993 = vmatprep.subr.mxu0 %v3345_v45  ;;  %v5097_v45 = vand.u32 4294901760, %v3419_v50 }
  0xf4   : > { %2597 = vmatpush1.msk.msra.mxu1 %vm468_vm9, %v5051_v32  ;;  %996 = vmatpush1.msra.mxu0 %v3396_v16  ;;  %v5098_v16 = vand.u32 4294901760, %v3430_v2 }
  0xf5   : > { %2598 = vmatprep.subr.msk.mxu1 %vm465_vm2, %v5051_v32  ;;  %999 = vmatprep.subr.mxu0 %v3410_v25  ;;  %v5099_v25 = vand.u32 4294901760, %v3484_v63 }
  0xf6   : > { %2599 = vmatpush1.msk.msra.mxu1 %vm464_vm3, %v5051_v32  ;;  %1002 = vmatpush1.msra.mxu0 %v3419_v50  ;;  %v5100_v50 = vand.u32 4294901760, %v3490_v19 }
  0xf7   : > { %2600 = vmatprep.subr.msk.mxu1 %vm461_vm10, %v5051_v32  ;;  %1005 = vmatprep.subr.mxu0 %v3430_v2  ;;  %v5102_v2 = vand.u32 4294901760, %v3492_v36 }
  0xf8   : > { %2601 = vmatpush1.msk.msra.mxu1 %vm460_vm11, %v5051_v32  ;;  %1008 = vmatpush1.msra.mxu0 %v3484_v63  ;;  %v5104_v63 = vand.u32 4294901760, %v3497_v5 }
  0xf9   : > { %2602 = vmatprep.subr.msk.mxu1 %vm457_vm12, %v5051_v32  ;;  %1011 = vmatprep.subr.mxu0 %v3490_v19 }
  0xfa   : > { %2603 = vmatpush1.msk.msra.mxu1 %vm456_vm13, %v5051_v32  ;;  %1014 = vmatpush1.msra.mxu0 %v3492_v36  ;;  %v5107_v36 = vand.u32 4294901760, %v3499_v26 }
  0xfb   : > { %2604 = vmatprep.subr.msk.mxu1 %vm453_vm14, %v5051_v32  ;;  %1017 = vmatprep.subr.mxu0 %v3497_v5 }
  0xfc   : > { %2605 = vmatpush1.msk.msra.mxu1 %vm5014_vm15, %v5051_v32  ;;  %1020 = vmatpush1.msra.mxu0 %v3499_v26  ;;  %vm5055_vm15 = vcmp.eq.s32.totalorder %v3253_v4, %v3098_v30 }
  0xfd   : > { %2606 = vmatprep.subr.msk.mxu1 %vm5053_vm7, %v5051_v32  ;;  %1023 = vmatprep.subr.mxu0 %v3515_v6  ;;  %vm5056_vm7 = vcmp.eq.s32.totalorder %v3253_v4, %v3100_v31 }
  0xfe   : > { %2607 = vmatpush1.msk.msra.mxu1 %vm5054_vm4, %v5051_v32  ;;  %1026 = vmatpush1.msra.mxu0 %v3530_v24  ;;  %vm431_vm4 = vcmp.eq.s32.totalorder %v3362_v61, %v3082_v17 }
  0xff   : > { %2608 = vmatprep.subr.msk.mxu1 %vm5055_vm15, %v5051_v32  ;;  %1029 = vmatprep.subr.mxu0 %v3544_v18  ;;  %vm5058_vm15 = vcmp.eq.s32.totalorder %v3312_v22, %v3100_v31 }
 0x100   : > { %2609 = vmatpush1.msk.msra.mxu1 %vm5056_vm7, %v5051_v32  ;;  %1032 = vmatpush1.msra.mxu0 %v3562_v0  ;;  %vm5059_vm7 = vcmp.eq.s32.totalorder %v3314_v23, %v3098_v30 }
 0x101   : > { %2610 = vmatprep.subr.msk.mxu1 %vm5057_vm5, %v5051_v32  ;;  %1035 = vmatprep.subr.mxu0 %v3576_v9  ;;  %vm5070_vm5 = vcmp.eq.s32.totalorder %v5065_v39, %v3098_v30 }
 0x102   : > { %2611 = vmatpush1.msk.msra.mxu1 %vm5058_vm15, %v5051_v32  ;;  %1038 = vmatpush1.msra.mxu0 %v3594_v10  ;;  %vm5061_vm15 = vcmp.eq.s32.totalorder %v3360_v60, %v3098_v30 }
 0x103   : > { %2612 = vmatprep.subr.msk.mxu1 %vm5059_vm7, %v5051_v32  ;;  %1041 = vmatprep.subr.mxu0 %v3608_v35  ;;  %vm5063_vm7 = vcmp.eq.s32.totalorder %v3360_v60, %v3100_v31 }
 0x104   : > { %2613 = vmatpush1.msk.msra.mxu1 %vm5060_vm6, %v5051_v32  ;;  %1044 = vmatpush1.msra.mxu0 %v3625_v57  ;;  %vm5077_vm6 = vcmp.eq.s32.totalorder %v5072_v1, %v3100_v31 }
 0x105   : > { %2614 = vmatprep.subr.msk.mxu1 %vm5061_vm15, %v5051_v32  ;;  %1080 = vmatmul.mubr.f32.vlgmr.msra.gmra.mxu0 %v5062_v15  ;;  %vm5066_vm15 = vcmp.eq.s32.totalorder %v3362_v61, %v3098_v30 }
 0x106   : > { %2615 = vmatpush1.msk.msra.mxu1 %vm5063_vm7, %v5051_v32  ;;  %1195 = vmatprep.subr.mxu0 %v5064_v51  ;;  %vm5068_vm7 = vcmp.eq.s32.totalorder %v3362_v61, %v3100_v31  ;;  %v5113_v51 = vand.u32 4294901760, %v3530_v24 }
 0x107   : > { %2616 = vmatprep.subr.msk.mxu1 %vm5066_vm15, %v5051_v32  ;;  %1199 = vmatpush1.msra.mxu0 %v5067_v28  ;;  %vm5080_vm15 = vcmp.eq.s32.totalorder %v5079_v56, %v3098_v30 }
 0x108   : > { %2617 = vmatpush1.msk.msra.mxu1 %vm5068_vm7, %v5051_v32  ;;  %1203 = vmatprep.subr.mxu0 %v5069_v41  ;;  %vm5073_vm7 = vcmp.eq.s32.totalorder %v5065_v39, %v3100_v31  ;;  %v5116_v41 = vand.u32 4294901760, %v3544_v18 }
 0x109   : > { %2618 = vmatprep.subr.msk.mxu1 %vm5070_vm5, %v5051_v32  ;;  %1207 = vmatpush1.msra.mxu0 %v5071_v29  ;;  %vm5075_vm5 = vcmp.eq.s32.totalorder %v5072_v1, %v3098_v30 }
 0x10a   : > { %2619 = vmatpush1.msk.msra.mxu1 %vm5073_vm7, %v5051_v32  ;;  %1211 = vmatprep.subr.mxu0 %v5074_v42  ;;  %vm5085_vm7 = vcmp.eq.s32.totalorder %v5082_v49, %v3098_v30  ;;  %v5119_v42 = vand.u32 4294901760, %v3562_v0 }
 0x10b   : > { %2620 = vmatprep.subr.msk.mxu1 %vm5075_vm5, %v5051_v32  ;;  %1215 = vmatpush1.msra.mxu0 %v5076_v52  ;;  %vm415_vm5 = vcmp.eq.s32.totalorder %v5082_v49, %v3082_v17 }
 0x10c   : > { %2621 = vmatpush1.msk.msra.mxu1 %vm5077_vm6, %v5051_v32  ;;  %1219 = vmatprep.subr.mxu0 %v5078_v53  ;;  %vm5083_vm6 = vcmp.eq.s32.totalorder %v5079_v56, %v3100_v31  ;;  %v5122_v53 = vand.u32 4294901760, %v3576_v9 }
 0x10d   : > { %2622 = vmatprep.subr.msk.mxu1 %vm5080_vm15, %v5051_v32  ;;  %1223 = vmatpush1.msra.mxu0 %v5081_v48  ;;  %vm5087_vm15 = vcmp.eq.s32.totalorder %v5082_v49, %v3100_v31 }
 0x10e   : > { %2623 = vmatpush1.msk.msra.mxu1 %vm5083_vm6, %v5051_v32  ;;  %1182 = vmatprep.mubr.f32.mxu1 %v5084_v58  ;;  %vm5120_vm6 = vcmp.eq.s32.totalorder %v3314_v23, %v3098_v30 }
 0x10f   : > { %2624 = vmatprep.subr.msk.mxu1 %vm5085_vm7, %v5051_v32  ;;  %1227 = vmatprep.subr.mxu0 %v5086_v8  ;;  %vm5118_vm7 = vcmp.eq.s32.totalorder %v3107_v34, %v3082_v17 }
 0x110   : > { %2625 = vmatpush1.msk.msra.mxu1 %vm5087_vm15, %v5051_v32  ;;  %1231 = vmatpush1.msra.mxu0 %v5088_v59  ;;  %v2553_v29 = vsel %vm5118_vm7, 1.0, %v5084_v58  ;;  %vm5121_vm15 = vcmp.eq.s32.totalorder %v3107_v34, %v3078_v13  ;;  %vm5134_vm7 = vcmp.eq.s32.totalorder %v3105_v33, %v3082_v17 }
 0x111   : > { %1186 = vmatmul.mubr.f32.vlgmr.msra.gmra.mxu1 %v5089_v46  ;;  %2626 = vmatprep.subr.msk.mxu1 %vm473_vm0, %v5051_v32  ;;  %vm5101_vm0 = vcmp.eq.s32.totalorder %v3203_v55, %v3100_v31  ;;  %v2552_v52 = vsel %vm5121_vm15, 1.0, %v5084_v58  ;;  %v4059_v48 = vsub.f32 %v2553_v29, %v2553_v29  ;;  %vm5136_vm15 = vcmp.eq.s32.totalorder %v3105_v33, %v3078_v13 }
 0x112   : > { %1235 = vmatprep.subr.mxu0 %v5090_v62  ;;  %2627 = vmatpush1.msk.msra.mxu1 %vm472_vm1, %v5051_v32  ;;  %vm5103_vm1 = vcmp.eq.s32.totalorder %v3251_v3, %v3098_v30 }
 0x113   : > { %1239 = vmatpush1.msra.mxu0 %v5091_v11  ;;  %2628 = vmatprep.subr.msk.mxu1 %vm469_vm8, %v5051_v32  ;;  %vm5108_vm8 = vcmp.eq.s32.totalorder %v3253_v4, %v3098_v30 }
 0x114   : > { %1243 = vmatprep.subr.mxu0 %v5092_v12  ;;  %2629 = vmatpush1.msk.msra.mxu1 %vm468_vm9, %v5051_v32  ;;  %vm5109_vm9 = vcmp.eq.s32.totalorder %v3105_v33, %v3078_v13 }
 0x115   : > { %1247 = vmatpush1.msra.mxu0 %v5093_v20  ;;  %2630 = vmatprep.subr.msk.mxu1 %vm465_vm2, %v5051_v32  ;;  %vm5105_vm2 = vcmp.eq.s32.totalorder %v3251_v3, %v3100_v31  ;;  %v2560_v5 = vsel %vm5109_vm9, 1.0, %v5084_v58  ;;  %vm5128_vm9 = vcmp.eq.s32.totalorder %v3201_v54, %v3082_v17 }
 0x116   : > { %1251 = vmatprep.subr.mxu0 %v5094_v21  ;;  %2631 = vmatpush1.msk.msra.mxu1 %vm464_vm3, %v5051_v32  ;;  %vm5106_vm3 = vcmp.eq.s32.totalorder %v3105_v33, %v3082_v17  ;;  %v4027_v24 = vsub.f32 %v2560_v5, %v2560_v5  ;;  %v2545_v59 = vsel %vm5128_vm9, 1.0, %v5084_v58  ;;  %vm5142_vm9 = vcmp.eq.s32.totalorder %v3147_v43, %v3078_v13 }
 0x117   : > { %1255 = vmatpush1.msra.mxu0 %v5095_v37  ;;  %2632 = vmatprep.subr.msk.mxu1 %vm461_vm10, %v5051_v32  ;;  %v2561_v19 = vsel %vm5106_vm3, 1.0, %v5084_v58  ;;  %vm5111_vm10 = vcmp.eq.s32.totalorder %v3253_v4, %v3100_v31  ;;  %vm5126_vm3 = vcmp.eq.s32.totalorder %v3360_v60, %v3100_v31  ;;  %v4119_v21 = vsub.f32 %v2545_v59, %v2545_v59 }
 0x118   : > { %1259 = vmatprep.subr.mxu0 %v5096_v38  ;;  %2633 = vmatpush1.msk.msra.mxu1 %vm460_vm11, %v5051_v32  ;;  %vm5112_vm11 = vcmp.eq.s32.totalorder %v3147_v43, %v3082_v17  ;;  %v4015_v6 = vsub.f32 %v2561_v19, %v2561_v19  ;;  %v5022_v35 = vand.u32 4294901760, %v4027_v24 }
 0x119   : > { %1263 = vmatpush1.msra.mxu0 %v5097_v45  ;;  %2634 = vmatprep.subr.msk.mxu1 %vm457_vm12, %v5051_v32  ;;  %v2557_v26 = vsel %vm5112_vm11, 1.0, %v5084_v58  ;;  %vm5114_vm12 = vcmp.eq.s32.totalorder %v3312_v22, %v3098_v30  ;;  %vm5130_vm11 = vcmp.eq.s32.totalorder %v3201_v54, %v3078_v13 }
 0x11a   : > { %1267 = vmatprep.subr.mxu0 %v5098_v16  ;;  %2635 = vmatpush1.msk.msra.mxu1 %vm456_vm13, %v5051_v32  ;;  %vm5115_vm13 = vcmp.eq.s32.totalorder %v3147_v43, %v3078_v13  ;;  %v4039_v18 = vsub.f32 %v2557_v26, %v2557_v26  ;;  %v5028_v8 = vand.u32 4294901760, %v4015_v6  ;;  %v2544_v11 = vsel %vm5130_vm11, 1.0, %v5084_v58 }
 0x11b   : > { %1271 = vmatpush1.msra.mxu0 %v5099_v25  ;;  %2636 = vmatprep.subr.msk.mxu1 %vm453_vm14, %v5051_v32  ;;  %v2556_v28 = vsel %vm5115_vm13, 1.0, %v5084_v58  ;;  %vm5117_vm14 = vcmp.eq.s32.totalorder %v3312_v22, %v3100_v31  ;;  %vm5132_vm13 = vcmp.eq.s32.totalorder %v5079_v56, %v3078_v13  ;;  %v1581_v38 = vsub.f32 %v4027_v24, %v5022_v35 }
 0x11c   : > { %1275 = vmatprep.subr.mxu0 %v5100_v50  ;;  %2637 = vmatpush1.msk.msra.mxu1 %vm5101_vm0, %v5051_v32  ;;  %vm5123_vm0 = vcmp.eq.s32.totalorder %v3314_v23, %v3100_v31  ;;  %v4051_v0 = vsub.f32 %v2556_v28, %v2556_v28  ;;  %v4107_v12 = vsel %vm5132_vm13, 1.0, %v5084_v58  ;;  %v1575_v37 = vsub.f32 %v4015_v6, %v5028_v8 }
 0x11d   : > { %1279 = vmatpush1.msra.mxu0 %v5102_v2  ;;  %2638 = vmatprep.subr.msk.mxu1 %vm5103_vm1, %v5051_v32  ;;  %vm5124_vm1 = vcmp.eq.s32.totalorder %v3360_v60, %v3098_v30  ;;  %v5019_v16 = vand.u32 4294901760, %v4059_v48  ;;  %v4155_v2 = vsub.f32 %v2544_v11, %v2544_v11  ;;  %vm5144_vm11 = vcmp.eq.s32.totalorder %v3251_v3, %v3078_v13 }
 0x11e   : > { %1283 = vmatprep.subr.mxu0 %v5104_v63  ;;  %2639 = vmatpush1.msk.msra.mxu1 %vm5105_vm2, %v5051_v32  ;;  %vm5125_vm2 = vcmp.eq.s32.totalorder %v3149_v44, %v3082_v17  ;;  %vm5146_vm13 = vcmp.eq.s32.totalorder %v3107_v34, %v3082_v17  ;;  %v4462_v15 = vsub.f32 %v4107_v12, %v4107_v12 }
 0x11f   : > { %1287 = vmatpush1.msra.mxu0 %v5107_v36  ;;  %2640 = vmatprep.subr.msk.mxu1 %vm5108_vm8, %v5051_v32  ;;  %v2549_v9 = vsel %vm5125_vm2, 1.0, %v5084_v58  ;;  %vm5127_vm8 = vcmp.eq.s32.totalorder %v3149_v44, %v3078_v13  ;;  %vm5139_vm2 = vcmp.eq.s32.totalorder %v5065_v39, %v3100_v31 }
 0x120   : > { %1291 = vmatprep.subr.mxu0 %v5110_v14  ;;  %2641 = vmatpush1.msk.msra.mxu1 %vm5111_vm10, %v5051_v32  ;;  %v2548_v10 = vsel %vm5127_vm8, 1.0, %v5084_v58  ;;  %vm5129_vm10 = vcmp.eq.s32.totalorder %v3362_v61, %v3098_v30  ;;  %v4092_v62 = vsub.f32 %v2549_v9, %v2549_v9  ;;  %vm5141_vm8 = vcmp.eq.s32.totalorder %v5072_v1, %v3098_v30 }
 0x121   : > { %1295 = vmatpush1.msra.mxu0 %v5113_v51  ;;  %2642 = vmatprep.subr.msk.mxu1 %vm5114_vm12, %v5051_v32  ;;  %vm5131_vm12 = vcmp.eq.s32.totalorder %v3203_v55, %v3082_v17  ;;  %v4117_v20 = vsub.f32 %v2548_v10, %v2548_v10  ;;  %v2536_v14 = vsel %vm5144_vm11, 1.0, %v5084_v58  ;;  %v1576_v51 = vand.u32 4294901760, %v1575_v37 }
 0x122   : > { %1299 = vmatprep.subr.mxu0 %v5116_v41  ;;  %2643 = vmatpush1.msk.msra.mxu1 %vm5117_vm14, %v5051_v32  ;;  %v2541_v57 = vsel %vm5131_vm12, 1.0, %v5084_v58  ;;  %vm5133_vm14 = vcmp.eq.s32.totalorder %v3362_v61, %v3100_v31  ;;  %v5015_v26 = vand.u32 4294901760, %v4092_v62  ;;  %vm5145_vm12 = vcmp.eq.s32.totalorder %v5072_v1, %v3100_v31 }
 0x123   : > { %1303 = vmatpush1.msra.mxu0 %v5119_v42  ;;  %2644 = vmatprep.subr.msk.mxu1 %vm5120_vm6, %v5051_v32  ;;  %vm5135_vm6 = vcmp.eq.s32.totalorder %v5065_v39, %v3098_v30  ;;  %v4157_v63 = vsub.f32 %v2541_v57, %v2541_v57  ;;  %v5016_v29 = vand.u32 4294901760, %v4117_v20  ;;  %v1582_v42 = vand.u32 4294901760, %v1581_v38 }
 0x124   : > { %1307 = vmatprep.subr.mxu0 %v5122_v53  ;;  %2645 = vmatpush1.msk.msra.mxu1 %vm5123_vm0, %v5051_v32  ;;  %vm5137_vm0 = vcmp.eq.s32.totalorder %v3203_v55, %v3078_v13  ;;  %v4225_v11 = vsub.f32 %v2536_v14, %v2536_v14  ;;  %v5018_v57 = vand.u32 4294901760, %v4119_v21  ;;  %vm5158_vm11 = vcmp.eq.s32.totalorder %v3312_v22, %v3078_v13 }
 0x125   : > { %1311 = vmatpush1.msra.mxu0 %v893_v47  ;;  %2646 = vmatprep.subr.msk.mxu1 %vm5124_vm1, %v5051_v32  ;;  %v4072_v47 = vsub.f32 %v2552_v52, %v2552_v52  ;;  %v2540_v45 = vsel %vm5137_vm0, 1.0, %v5084_v58  ;;  %vm5138_vm1 = vcmp.eq.s32.totalorder %v5082_v49, %v3078_v13  ;;  %v1599_v52 = vsub.f32 %v4059_v48, %v5019_v16 }
 0x126   : > { %1315 = vmatprep.subr.mxu0 %v899_v7  ;;  %2647 = vmatpush1.msk.msra.mxu1 %vm5126_vm3, %v5051_v32  ;;  %v5021_v7 = vand.u32 4294901760, %v4039_v18  ;;  %v4145_v50 = vsel %vm5138_vm1, 1.0, %v5084_v58  ;;  %vm5140_vm3 = vcmp.eq.s32.totalorder %v3147_v43, %v3082_v17  ;;  %v4190_v28 = vsub.f32 %v2540_v45, %v2540_v45 }
 0x127   : > { %1319 = vmatpush1.msra.mxu0 %v905_v40  ;;  %1352 = vmatprep.mubr.f32.mxu0 %v5084_v58  ;;  %v5020_v40 = vand.u32 4294901760, %v4051_v0  ;;  %v5017_v25 = vand.u32 4294901760, %v4072_v47  ;;  %vm5151_vm0 = vcmp.eq.s32.totalorder %v5079_v56, %v3100_v31  ;;  %vm5152_vm1 = vcmp.eq.s32.totalorder %v3149_v44, %v3082_v17 }
 0x128   : > { %2648 = vmatprep.subr.msk.mxu1 %vm5129_vm10, %v5051_v32  ;;  %1354 = vmatmul.mubr.f32.vlgmr.msra.gmra.mxu0 %v3093_v27  ;;  %v1587_v19 = vsub.f32 %v4039_v18, %v5021_v7  ;;  %vm5143_vm10 = vcmp.eq.s32.totalorder %v3251_v3, %v3082_v17  ;;  %v1611_v45 = vsub.f32 %v4092_v62, %v5015_v26  ;;  %v5026_v14 = vand.u32 4294901760, %v4157_v63 }
 0x129   : > { %2649 = vmatpush1.msk.msra.mxu1 %vm5133_vm14, %v5051_v32  ;;  %2658 = vmatprep.subr.msk.mxu0 %vm5134_vm7, %v5051_v32  ;;  %v2537_v36 = vsel %vm5143_vm10, 1.0, %v5084_v58  ;;  %v1593_v5 = vsub.f32 %v4051_v0, %v5020_v40  ;;  %vm5147_vm14 = vcmp.eq.s32.totalorder %v3253_v4, %v3082_v17  ;;  %vm5148_vm7 = vcmp.eq.s32.totalorder %v5079_v56, %v3098_v30 }
 0x12a   : > { %2650 = vmatprep.subr.msk.mxu1 %vm5135_vm6, %v5051_v32  ;;  %2659 = vmatpush1.msk.msra.mxu0 %vm5136_vm15, %v5051_v32  ;;  %v2533_v41 = vsel %vm5147_vm14, 1.0, %v5084_v58  ;;  %vm5149_vm6 = vcmp.eq.s32.totalorder %v3107_v34, %v3078_v13  ;;  %v1605_v53 = vsub.f32 %v4072_v47, %v5017_v25  ;;  %vm5150_vm15 = vcmp.eq.s32.totalorder %v3253_v4, %v3078_v13 }
 0x12b   : > { %2651 = vmatpush1.msk.msra.mxu1 %vm5139_vm2, %v5051_v32  ;;  %2660 = vmatprep.subr.msk.mxu0 %vm5140_vm3, %v5051_v32  ;;  %v2532_v9 = vsel %vm5150_vm15, 1.0, %v5084_v58  ;;  %v1588_v10 = vand.u32 4294901760, %v1587_v19  ;;  %v4223_v59 = vsub.f32 %v2537_v36, %v2537_v36  ;;  %vm5153_vm2 = vcmp.eq.s32.totalorder %v5082_v49, %v3098_v30 }
 0x12c   : > { %2652 = vmatprep.subr.msk.mxu1 %vm5141_vm8, %v5051_v32  ;;  %2661 = vmatpush1.msk.msra.mxu0 %vm5142_vm9, %v5051_v32  ;;  %vm5154_vm3 = vcmp.eq.s32.totalorder %v3149_v44, %v3078_v13  ;;  %v1594_v37 = vand.u32 4294901760, %v1593_v5  ;;  %v4236_v38 = vsub.f32 %v2533_v41, %v2533_v41  ;;  %v5023_v19 = vand.u32 4294901760, %v4155_v2 }
 0x12d   : > { %2653 = vmatpush1.msk.msra.mxu1 %vm5145_vm12, %v5051_v32  ;;  %2662 = vmatprep.subr.msk.mxu0 %vm5146_vm13, %v5051_v32  ;;  %vm5155_vm8 = vcmp.eq.s32.totalorder %v5082_v49, %v3100_v31  ;;  %v4247_v30 = vsub.f32 %v2532_v9, %v2532_v9  ;;  %vm5156_vm9 = vcmp.eq.s32.totalorder %v3312_v22, %v3082_v17  ;;  %v1600_v31 = vand.u32 4294901760, %v1599_v52 }
 0x12e   : > { %2654 = vmatprep.subr.msk.mxu1 %vm5148_vm7, %v5051_v32  ;;  %2663 = vmatpush1.msk.msra.mxu0 %vm5149_vm6, %v5051_v32  ;;  %v2529_v36 = vsel %vm5156_vm9, 1.0, %v5084_v58  ;;  %v1617_v5 = vsub.f32 %v4117_v20, %v5016_v29  ;;  %vm5157_vm10 = vcmp.eq.s32.totalorder %v3201_v54, %v3082_v17  ;;  %v1606_v41 = vand.u32 4294901760, %v1605_v53 }
 0x12f   : > { %2655 = vmatpush1.msk.msra.mxu1 %vm5151_vm0, %v5051_v32  ;;  %2664 = vmatprep.subr.msk.mxu0 %vm5152_vm1, %v5051_v32  ;;  %v2528_v9 = vsel %vm5158_vm11, 1.0, %v5084_v58  ;;  %v5025_v26 = vand.u32 4294901760, %v4190_v28  ;;  %vm5159_vm12 = vcmp.eq.s32.totalorder %v3201_v54, %v3078_v13  ;;  %v1623_v29 = vsub.f32 %v4119_v21, %v5018_v57 }
 0x130   : > { %2656 = vmatprep.subr.msk.mxu1 %vm5153_vm2, %v5051_v32  ;;  %2665 = vmatpush1.msk.msra.mxu0 %vm5154_vm3, %v5051_v32  ;;  %vm5160_vm13 = vcmp.eq.s32.totalorder %v3314_v23, %v3082_v17  ;;  %vm5161_vm14 = vcmp.eq.s32.totalorder %v3314_v23, %v3078_v13  ;;  %v5024_v25 = vand.u32 4294901760, %v4223_v59  ;;  %vm5162_vm7 = vcmp.eq.s32.totalorder %v3203_v55, %v3082_v17 }
 0x131   : > { %2657 = vmatpush1.msk.msra.mxu1 %vm5155_vm8, %v5051_v32  ;;  %1456 = vmatprep.mubr.f32.mxu1 %v5084_v58  ;;  %v2525_v52 = vsel %vm5160_vm13, 1.0, %v5084_v58  ;;  %v2524_v53 = vsel %vm5161_vm14, 1.0, %v5084_v58  ;;  %v4287_v57 = vsub.f32 %v2529_v36, %v2529_v36  ;;  %v1629_v16 = vsub.f32 %v4155_v2, %v5023_v19 }
 0x132   : > { %2666 = vmatprep.subr.msk.mxu0 %vm5157_vm10, %v5051_v32  ;;  %1458 = vmatmul.mubr.f32.vlgmr.msra.gmra.mxu1 %v3093_v27  ;;  %v5027_v40 = vand.u32 4294901760, %v4225_v11  ;;  %vm5163_vm6 = vcmp.eq.s32.totalorder %v3203_v55, %v3078_v13  ;;  %v1618_v7 = vand.u32 4294901760, %v1617_v5  ;;  %v4297_v35 = vsub.f32 %v2528_v9, %v2528_v9 }
 0x133   : > { %2667 = vmatpush1.msk.msra.mxu0 %vm5159_vm12, %v5051_v32  ;;  %1577 = vmatprep.subr.mxu1 %v1576_v51  ;;  %v1612_v51 = vand.u32 4294901760, %v1611_v45  ;;  %v5029_v45 = vand.u32 4294901760, %v4236_v38  ;;  %vm5164_vm15 = vcmp.eq.s32.totalorder %v3251_v3, %v3082_v17  ;;  %v4307_v36 = vsub.f32 %v2525_v52, %v2525_v52 }
 0x134   : > { %2668 = vmatprep.subr.msk.mxu0 %vm5162_vm7, %v5051_v32  ;;  %1583 = vmatpush1.msra.mxu1 %v1582_v42  ;;  %v1635_v42 = vsub.f32 %v4157_v63, %v5026_v14  ;;  %v4309_v19 = vsub.f32 %v2524_v53, %v2524_v53  ;;  %vm5165_vm0 = vcmp.eq.s32.totalorder %v3360_v60, %v3082_v17  ;;  %v2517_v53 = vsel %vm431_vm4, 1.0, %v5084_v58 }
 0x135   : > { %2669 = vmatpush1.msk.msra.mxu0 %vm5163_vm6, %v5051_v32  ;;  %1589 = vmatprep.subr.mxu1 %v1588_v10  ;;  %v2521_v10 = vsel %vm5165_vm0, 1.0, %v5084_v58  ;;  %v1641_v5 = vsub.f32 %v4190_v28, %v5025_v26  ;;  %vm5166_vm1 = vcmp.eq.s32.totalorder %v3251_v3, %v3078_v13  ;;  %vm5167_vm2 = vcmp.eq.s32.totalorder %v3360_v60, %v3078_v13 }
 0x136   : > { %2670 = vmatprep.subr.msk.mxu0 %vm5164_vm15, %v5051_v32  ;;  %1595 = vmatpush1.msra.mxu1 %v1594_v37  ;;  %v1624_v37 = vand.u32 4294901760, %v1623_v29  ;;  %v2520_v9 = vsel %vm5167_vm2, 1.0, %v5084_v58  ;;  %v1647_v52 = vsub.f32 %v4223_v59, %v5024_v25  ;;  %vm5168_vm3 = vcmp.eq.s32.totalorder %v3253_v4, %v3082_v17  ;;  %vm5177_vm15 = vmmov %vm5165_vm0 }
 0x137   : > { %2671 = vmatpush1.msk.msra.mxu0 %vm5166_vm1, %v5051_v32  ;;  %1601 = vmatprep.subr.mxu1 %v1600_v31  ;;  %v1630_v29 = vand.u32 4294901760, %v1629_v16  ;;  %v1653_v31 = vsub.f32 %v4225_v11, %v5027_v40  ;;  %vm5169_vm8 = vcmp.eq.s32.totalorder %v3362_v61, %v3078_v13  ;;  %vm5170_vm9 = vcmp.eq.s32.totalorder %v3253_v4, %v3078_v13  ;;  %vm5179_vm1 = vmmov %vm5167_vm2 }
 0x138   : > { %2672 = vmatprep.subr.msk.mxu0 %vm5168_vm3, %v5051_v32  ;;  %1607 = vmatpush1.msra.mxu1 %v1606_v41  ;;  %v2516_v25 = vsel %vm5169_vm8, 1.0, %v5084_v58  ;;  %v1636_v14 = vand.u32 4294901760, %v1635_v42  ;;  %v4349_v41 = vsub.f32 %v2521_v10, %v2521_v10  ;;  %v1659_v16 = vsub.f32 %v4236_v38, %v5029_v45  ;;  %vm5182_vm3 = vmmov %vm5169_vm8 }
 0x139   : > { %2673 = vmatpush1.msk.msra.mxu0 %vm5170_vm9, %v5051_v32  ;;  %1613 = vmatprep.subr.mxu1 %v1612_v51  ;;  %v5030_v40 = vand.u32 4294901760, %v4287_v57  ;;  %vm5171_vm10 = vcmp.eq.s32.totalorder %v3312_v22, %v3082_v17  ;;  %v1642_v8 = vand.u32 4294901760, %v1641_v5  ;;  %v4359_v26 = vsub.f32 %v2520_v9, %v2520_v9 }
 0x13a   : > { %2674 = vmatprep.subr.msk.mxu0 %vm5171_vm10, %v5051_v32  ;;  %1619 = vmatpush1.msra.mxu1 %v1618_v7  ;;  %v4361_v46 = vsub.f32 %v2517_v53, %v2517_v53  ;;  %v5031_v51 = vand.u32 4294901760, %v4297_v35  ;;  %v1648_v42 = vand.u32 4294901760, %v1647_v52  ;;  %v4368_v10 = vsub.f32 %v2516_v25, %v2516_v25 }
 0x13b   : > { %2675 = vmatpush1.msk.msra.mxu0 %vm5158_vm11, %v5051_v32  ;;  %1625 = vmatprep.subr.mxu1 %v1624_v37  ;;  %vm5172_vm12 = vcmp.eq.s32.totalorder %v5065_v39, %v3082_v17  ;;  %v5032_v5 = vand.u32 4294901760, %v4307_v36  ;;  %v1654_v9 = vand.u32 4294901760, %v1653_v31  ;;  %v5173_v53 = vand.u32 4294901760, %v4247_v30 }
 0x13c   : > { %v2513_v7 = vsel %vm5172_vm12, 1.0, %v5084_v58  ;;  %2676 = vmatprep.subr.msk.mxu0 %vm5160_vm13, %v5051_v32  ;;  %1631 = vmatpush1.msra.mxu1 %v1630_v29  ;;  %vm5174_vm14 = vcmp.eq.s32.totalorder %v5065_v39, %v3078_v13  ;;  %vm5175_vm7 = vcmp.eq.s32.totalorder %v3314_v23, %v3078_v13  ;;  %v1660_v45 = vand.u32 4294901760, %v1659_v16  ;;  %vm5184_vm8 = vmmov %vm5172_vm12 }
 0x13d   : > { %v1665_v37 = vsub.f32 %v4247_v30, %v5173_v53  ;;  %v2512_v25 = vsel %vm5174_vm14, 1.0, %v5084_v58  ;;  %2677 = vmatpush1.msk.msra.mxu0 %vm5175_vm7, %v5051_v32  ;;  %1637 = vmatprep.subr.mxu1 %v1636_v14  ;;  %v1671_v29 = vsub.f32 %v4287_v57, %v5030_v40  ;;  %vm5176_vm6 = vcmp.eq.s32.totalorder %v5072_v1, %v3082_v17  ;;  %vm5186_vm9 = vmmov %vm5174_vm14 }
 0x13e   : > { %v2509_v31 = vsel %vm5176_vm6, 1.0, %v5084_v58  ;;  %2678 = vmatprep.subr.msk.mxu0 %vm5177_vm15, %v5051_v32  ;;  %1643 = vmatpush1.msra.mxu1 %v1642_v8  ;;  %v4403_v52 = vsub.f32 %v2513_v7, %v2513_v7  ;;  %v1677_v14 = vsub.f32 %v4297_v35, %v5031_v51  ;;  %vm5178_vm0 = vcmp.eq.s32.totalorder %v5072_v1, %v3078_v13  ;;  %vm5188_vm10 = vmmov %vm5176_vm6 }
 0x13f   : > { %v2508_v16 = vsel %vm5178_vm0, 1.0, %v5084_v58  ;;  %2679 = vmatpush1.msk.msra.mxu0 %vm5179_vm1, %v5051_v32  ;;  %1649 = vmatprep.subr.mxu1 %v1648_v42  ;;  %v4417_v8 = vsub.f32 %v2512_v25, %v2512_v25  ;;  %v1683_v7 = vsub.f32 %v4307_v36, %v5032_v5  ;;  %vm5180_vm2 = vcmp.eq.s32.totalorder %v5079_v56, %v3082_v17  ;;  %vm5190_vm11 = vmmov %vm5178_vm0 }
 0x140   : > { %v2505_v51 = vsel %vm5180_vm2, 1.0, %v5084_v58  ;;  %2680 = vmatprep.subr.msk.mxu0 %vm431_vm4, %v5051_v32  ;;  %1655 = vmatpush1.msra.mxu1 %v1654_v9  ;;  %v1666_v42 = vand.u32 4294901760, %v1665_v37  ;;  %v4431_v25 = vsub.f32 %v2509_v31, %v2509_v31  ;;  %v5181_v40 = vand.u32 4294901760, %v4309_v19  ;;  %vm5191_vm12 = vmmov %vm5180_vm2 }
 0x141   : > { %2681 = vmatpush1.msk.msra.mxu0 %vm5182_vm3, %v5051_v32  ;;  %1661 = vmatprep.subr.mxu1 %v1660_v45  ;;  %v1672_v53 = vand.u32 4294901760, %v1671_v29  ;;  %v4441_v60 = vsub.f32 %v2508_v16, %v2508_v16  ;;  %v5183_v9 = vand.u32 4294901760, %v4349_v41  ;;  %v1678_v31 = vand.u32 4294901760, %v1677_v14 }
 0x142   : > { %v1689_v5 = vsub.f32 %v4309_v19, %v5181_v40  ;;  %v2501_v40 = vsel %vm415_vm5, 1.0, %v5084_v58  ;;  %2682 = vmatprep.subr.msk.mxu0 %vm5184_vm8, %v5051_v32  ;;  %1667 = vmatpush1.msra.mxu1 %v1666_v42  ;;  %v4454_v45 = vsub.f32 %v2505_v51, %v2505_v51  ;;  %v5185_v29 = vand.u32 4294901760, %v4359_v26 }
 0x143   : > { %v1695_v37 = vsub.f32 %v4349_v41, %v5183_v9  ;;  %2683 = vmatpush1.msk.msra.mxu0 %vm5186_vm9, %v5051_v32  ;;  %1673 = vmatprep.subr.mxu1 %v1672_v53  ;;  %v1684_v42 = vand.u32 4294901760, %v1683_v7  ;;  %v5187_v51 = vand.u32 4294901760, %v4361_v46  ;;  %v5037_v61 = vand.u32 4294901760, %v4417_v8 }
 0x144   : > { %v1701_v16 = vsub.f32 %v4359_v26, %v5185_v29  ;;  %2684 = vmatprep.subr.msk.mxu0 %vm5188_vm10, %v5051_v32  ;;  %1679 = vmatpush1.msra.mxu1 %v1678_v31  ;;  %v1690_v12 = vand.u32 4294901760, %v1689_v5  ;;  %v4476_v29 = vsub.f32 %v2501_v40, %v2501_v40  ;;  %v5189_v9 = vand.u32 4294901760, %v4368_v10 }
 0x145   : > { %v1707_v14 = vsub.f32 %v4361_v46, %v5187_v51  ;;  %v4484_v51 = vsub.f32 %v4145_v50, %v4145_v50  ;;  %2685 = vmatpush1.msk.msra.mxu0 %vm5190_vm11, %v5051_v32  ;;  %1685 = vmatprep.subr.mxu1 %v1684_v42  ;;  %v1696_v31 = vand.u32 4294901760, %v1695_v37  ;;  %v5039_v5 = vand.u32 4294901760, %v4441_v60 }
 0x146   : > { %v1713_v53 = vsub.f32 %v4368_v10, %v5189_v9  ;;  %2686 = vmatprep.subr.msk.mxu0 %vm5191_vm12, %v5051_v32  ;;  %1691 = vmatpush1.msra.mxu1 %v1690_v12  ;;  %v1702_v40 = vand.u32 4294901760, %v1701_v16  ;;  %v5192_v9 = vand.u32 4294901760, %v4403_v52  ;;  %vm5193_vm13 = vcmp.eq.s32.totalorder %v5079_v56, %v3078_v13 }
 0x147   : > { %2687 = vmatpush1.msk.msra.mxu0 %vm5193_vm13, %v5051_v32  ;;  %1697 = vmatprep.subr.mxu1 %v1696_v31  ;;  %v1708_v37 = vand.u32 4294901760, %v1707_v14  ;;  %v1725_v42 = vsub.f32 %v4417_v8, %v5037_v61  ;;  %vm5195_vm14 = vcmp.eq.s32.totalorder %v5082_v49, %v3078_v13  ;;  %v1737_v14 = vsub.f32 %v4441_v60, %v5039_v5  ;;  %v5197_v31 = vld [vmem:[#allocation12_spill] sm:$0xff] }
 0x148   : > { %v1719_v50 = vsub.f32 %v4403_v52, %v5192_v9  ;;  %2688 = vmatprep.subr.msk.mxu0 %vm415_vm5, %v5051_v32  ;;  %1703 = vmatpush1.msra.mxu1 %v1702_v40  ;;  %v1714_v16 = vand.u32 4294901760, %v1713_v53  ;;  %v5194_v9 = vand.u32 4294901760, %v4431_v25  ;;  %v1760_v61 = vand.u32 4294901760, %v4484_v51 }
 0x149   : > { %2689 = vmatpush1.msk.msra.mxu0 %vm5195_vm14, %v5051_v32  ;;  %1709 = vmatprep.subr.mxu1 %v1708_v37  ;;  %v5196_v40 = vand.u32 4294901760, %v4454_v45  ;;  %v1726_v12 = vand.u32 4294901760, %v1725_v42  ;;  %v5198_v37 = vand.u32 4294901760, %v4462_v15  ;;  %vm5200_vm7 = vcmp.eq.s32.totalorder %v3105_v33, %v3082_v17 }
 0x14a   : > { %v1731_v7 = vsub.f32 %v4431_v25, %v5194_v9  ;;  %1560 = vmatprep.mubr.f32.mxu0 %v5084_v58  ;;  %1715 = vmatpush1.msra.mxu1 %v1714_v16  ;;  %v1720_v53 = vand.u32 4294901760, %v1719_v50  ;;  %v5199_v16 = vand.u32 4294901760, %v4476_v29  ;;  %v1761_v42 = vsub.f32 %v4484_v51, %v1760_v61 }
 0x14b   : > { %v1743_v9 = vsub.f32 %v4454_v45, %v5196_v40  ;;  %1806 = vmatprep.subr.mxu0 %v4015_v6  ;;  %1566 = vmatmul.mubr.f32.vlgmr.msra.gmra.mxu0 %v5197_v31  ;;  %v1749_v49 = vsub.f32 %v4462_v15, %v5198_v37  ;;  %v1738_v40 = vand.u32 4294901760, %v1737_v14  ;;  %vm5201_vm6 = vcmp.eq.s32.totalorder %v3105_v33, %v3078_v13  ;;  %v5224_v14 = vld [vmem:[#allocation10_spill] sm:$0xff] }
 0x14c   : > { %1721 = vmatprep.subr.mxu1 %v1720_v53  ;;  %1809 = vmatpush1.msra.mxu0 %v4027_v24  ;;  %v1732_v5 = vand.u32 4294901760, %v1731_v7  ;;  %v1755_v50 = vsub.f32 %v4476_v29, %v5199_v16  ;;  %vm5202_vm15 = vcmp.eq.s32.totalorder %v3147_v43, %v3082_v17  ;;  %vm5203_vm0 = vcmp.eq.s32.totalorder %v3147_v43, %v3078_v13 }
 0x14d   : > { %1727 = vmatpush1.msra.mxu1 %v1726_v12  ;;  %1812 = vmatprep.subr.mxu0 %v4039_v18  ;;  %v1744_v31 = vand.u32 4294901760, %v1743_v9  ;;  %v1750_v7 = vand.u32 4294901760, %v1749_v49  ;;  %v1762_v12 = vand.u32 4294901760, %v1761_v42  ;;  %vm5204_vm1 = vcmp.eq.s32.totalorder %v3107_v34, %v3082_v17  ;;  %v5220_v49 = vld [vmem:[#allocation13_spill] sm:$0xff] }
 0x14e   : > { %1733 = vmatprep.subr.mxu1 %v1732_v5  ;;  %1815 = vmatpush1.msra.mxu0 %v4051_v0  ;;  %v1756_v53 = vand.u32 4294901760, %v1755_v50  ;;  %vm5205_vm2 = vcmp.eq.s32.totalorder %v3107_v34, %v3078_v13  ;;  %vm5206_vm3 = vcmp.eq.s32.totalorder %v3149_v44, %v3082_v17  ;;  %vm5207_vm8 = vcmp.eq.s32.totalorder %v3149_v44, %v3078_v13  ;;  %v5223_v5 = vld [vmem:[#allocation14_spill] sm:$0xff] }
 0x14f   : > { %1739 = vmatpush1.msra.mxu1 %v1738_v40  ;;  %1818 = vmatprep.subr.mxu0 %v4059_v48  ;;  %vm5208_vm9 = vcmp.eq.s32.totalorder %v3201_v54, %v3082_v17  ;;  %vm5209_vm10 = vcmp.eq.s32.totalorder %v3201_v54, %v3078_v13  ;;  %vm5210_vm11 = vcmp.eq.s32.totalorder %v3203_v55, %v3082_v17  ;;  %v5226_v9 = vand.u32 4294901760, %v4015_v6  ;;  %v5239_v50 = vld [vmem:[#allocation18_spill] sm:$0xff] }
 0x150   : > { %1745 = vmatprep.subr.mxu1 %v1744_v31  ;;  %1821 = vmatpush1.msra.mxu0 %v4072_v47  ;;  %vm5211_vm12 = vcmp.eq.s32.totalorder %v3203_v55, %v3078_v13  ;;  %vm5212_vm13 = vcmp.eq.s32.totalorder %v3251_v3, %v3082_v17  ;;  %vm5213_vm14 = vcmp.eq.s32.totalorder %v3251_v3, %v3078_v13  ;;  %v5228_v37 = vand.u32 4294901760, %v4027_v24 }
 0x151   : > { %1751 = vmatpush1.msra.mxu1 %v1750_v7  ;;  %1824 = vmatprep.subr.mxu0 %v4092_v62  ;;  %v5230_v16 = vand.u32 4294901760, %v4039_v18  ;;  %v5232_v6 = vand.u32 4294901760, %v4051_v0  ;;  %v5234_v24 = vand.u32 4294901760, %v4059_v48  ;;  %v5236_v18 = vand.u32 4294901760, %v4072_v47 }
 0x152   : > { %1757 = vmatprep.subr.mxu1 %v1756_v53  ;;  %1827 = vmatpush1.msra.mxu0 %v4117_v20  ;;  %v5238_v0 = vand.u32 4294901760, %v4092_v62  ;;  %v5240_v48 = vand.u32 4294901760, %v4117_v20  ;;  %v5242_v47 = vand.u32 4294901760, %v4119_v21  ;;  %v5243_v62 = vld [vmem:[#allocation11_spill] sm:$0xff]  ;;  %v5244_v40 = vand.u32 4294901760, %v4155_v2 }
 0x153   : > { %1763 = vmatpush1.msra.mxu1 %v1762_v12  ;;  %1796 = vmatprep.mubr.f32.mxu1 %v5084_v58  ;;  %v5246_v20 = vand.u32 4294901760, %v4157_v63 }
 0x154   : > { %1830 = vmatprep.subr.mxu0 %v4119_v21  ;;  %1798 = vmatmul.mubr.f32.vlgmr.msra.gmra.mxu1 %v3093_v27  ;;  %v5248_v21 = vand.u32 4294901760, %v4190_v28 }
 0x155   : > { %1833 = vmatpush1.msra.mxu0 %v4155_v2  ;;  %2690 = vmatprep.subr.msk.mxu1 %vm5200_vm7, %v5051_v32  ;;  %vm5214_vm7 = vcmp.eq.s32.totalorder %v3253_v4, %v3082_v17  ;;  %v5250_v2 = vand.u32 4294901760, %v4223_v59 }
 0x156   : > { %1836 = vmatprep.subr.mxu0 %v4157_v63  ;;  %2691 = vmatpush1.msk.msra.mxu1 %vm5201_vm6, %v5051_v32  ;;  %vm5215_vm6 = vcmp.eq.s32.totalorder %v3253_v4, %v3078_v13  ;;  %v5252_v63 = vand.u32 4294901760, %v4225_v11 }
 0x157   : > { %1839 = vmatpush1.msra.mxu0 %v4190_v28  ;;  %2692 = vmatprep.subr.msk.mxu1 %vm5202_vm15, %v5051_v32  ;;  %vm5216_vm15 = vcmp.eq.s32.totalorder %v3312_v22, %v3082_v17  ;;  %v5256_v28 = vand.u32 4294901760, %v4247_v30 }
 0x158   : > { %1842 = vmatprep.subr.mxu0 %v4223_v59  ;;  %2693 = vmatpush1.msk.msra.mxu1 %vm5203_vm0, %v5051_v32  ;;  %vm5217_vm0 = vcmp.eq.s32.totalorder %v3312_v22, %v3078_v13  ;;  %v5260_v59 = vand.u32 4294901760, %v4297_v35 }
 0x159   : > { %1845 = vmatpush1.msra.mxu0 %v4225_v11  ;;  %2694 = vmatprep.subr.msk.mxu1 %vm5204_vm1, %v5051_v32  ;;  %vm5218_vm1 = vcmp.eq.s32.totalorder %v3314_v23, %v3082_v17  ;;  %v5264_v11 = vand.u32 4294901760, %v4309_v19 }
 0x15a   : > { %1848 = vmatprep.subr.mxu0 %v4236_v38  ;;  %2695 = vmatpush1.msk.msra.mxu1 %vm5205_vm2, %v5051_v32  ;;  %vm5219_vm2 = vcmp.eq.s32.totalorder %v3314_v23, %v3078_v13 }
 0x15b   : > { %1851 = vmatpush1.msra.mxu0 %v4247_v30  ;;  %2696 = vmatprep.subr.msk.mxu1 %vm5206_vm3, %v5051_v32  ;;  %vm5221_vm3 = vcmp.eq.s32.totalorder %v5220_v49, %v3082_v17 }
 0x15c   : > { %1854 = vmatprep.subr.mxu0 %v4287_v57  ;;  %2697 = vmatpush1.msk.msra.mxu1 %vm5207_vm8, %v5051_v32  ;;  %vm5222_vm8 = vcmp.eq.s32.totalorder %v5220_v49, %v3078_v13 }
 0x15d   : > { %1857 = vmatpush1.msra.mxu0 %v4297_v35  ;;  %2698 = vmatprep.subr.msk.mxu1 %vm5208_vm9, %v5051_v32  ;;  %vm5225_vm9 = vcmp.eq.s32.totalorder %v5223_v5, %v3078_v13  ;;  %v5268_v35 = vand.u32 4294901760, %v4359_v26 }
 0x15e   : > { %1860 = vmatprep.subr.mxu0 %v4307_v36  ;;  %2699 = vmatpush1.msk.msra.mxu1 %vm5209_vm10, %v5051_v32  ;;  %vm5227_vm10 = vcmp.eq.s32.totalorder %v5065_v39, %v3082_v17 }
 0x15f   : > { %1863 = vmatpush1.msra.mxu0 %v4309_v19  ;;  %2700 = vmatprep.subr.msk.mxu1 %vm5210_vm11, %v5051_v32  ;;  %vm5229_vm11 = vcmp.eq.s32.totalorder %v5065_v39, %v3078_v13 }
 0x160   : > { %1866 = vmatprep.subr.mxu0 %v4349_v41  ;;  %2701 = vmatpush1.msk.msra.mxu1 %vm5211_vm12, %v5051_v32  ;;  %vm5231_vm12 = vcmp.eq.s32.totalorder %v5072_v1, %v3082_v17 }
 0x161   : > { %1869 = vmatpush1.msra.mxu0 %v4359_v26  ;;  %2702 = vmatprep.subr.msk.mxu1 %vm5212_vm13, %v5051_v32  ;;  %vm5233_vm13 = vcmp.eq.s32.totalorder %v5072_v1, %v3078_v13  ;;  %v5280_v26 = vand.u32 4294901760, %v4441_v60 }
 0x162   : > { %1872 = vmatprep.subr.mxu0 %v4361_v46  ;;  %2703 = vmatpush1.msk.msra.mxu1 %vm5213_vm14, %v5051_v32  ;;  %vm5235_vm14 = vcmp.eq.s32.totalorder %v5079_v56, %v3082_v17 }
 0x163   : > { %1875 = vmatpush1.msra.mxu0 %v4368_v10  ;;  %2704 = vmatprep.subr.msk.mxu1 %vm5214_vm7, %v5051_v32  ;;  %vm5237_vm7 = vcmp.eq.s32.totalorder %v5079_v56, %v3078_v13 }
 0x164   : > { %1878 = vmatprep.subr.mxu0 %v4403_v52  ;;  %2705 = vmatpush1.msk.msra.mxu1 %vm5215_vm6, %v5051_v32  ;;  %vm5241_vm6 = vcmp.eq.s32.totalorder %v5239_v50, %v3078_v13 }
 0x165   : > { %1881 = vmatpush1.msra.mxu0 %v4417_v8  ;;  %2706 = vmatprep.subr.msk.mxu1 %vm5216_vm15, %v5051_v32  ;;  %vm5245_vm15 = vcmp.eq.s32.totalorder %v3105_v33, %v3082_v17 }
 0x166   : > { %1884 = vmatprep.subr.mxu0 %v4431_v25  ;;  %2707 = vmatpush1.msk.msra.mxu1 %vm5217_vm0, %v5051_v32  ;;  %vm5247_vm0 = vcmp.eq.s32.totalorder %v3105_v33, %v3078_v13  ;;  %v5254_v33 = vand.u32 4294901760, %v4236_v38  ;;  %v5284_v38 = vand.u32 4294901760, %v4462_v15 }
 0x167   : > { %1887 = vmatpush1.msra.mxu0 %v4441_v60  ;;  %2708 = vmatprep.subr.msk.mxu1 %vm5218_vm1, %v5051_v32  ;;  %vm5249_vm1 = vcmp.eq.s32.totalorder %v3147_v43, %v3082_v17 }
 0x168   : > { %1890 = vmatprep.subr.mxu0 %v4454_v45  ;;  %2709 = vmatpush1.msk.msra.mxu1 %vm5219_vm2, %v5051_v32  ;;  %vm5251_vm2 = vcmp.eq.s32.totalorder %v3147_v43, %v3078_v13  ;;  %v5258_v43 = vand.u32 4294901760, %v4287_v57  ;;  %v5272_v57 = vand.u32 4294901760, %v4368_v10 }
 0x169   : > { %1893 = vmatpush1.msra.mxu0 %v4462_v15  ;;  %2710 = vmatprep.subr.msk.mxu1 %vm5221_vm3, %v5051_v32  ;;  %vm5253_vm3 = vcmp.eq.s32.totalorder %v3107_v34, %v3082_v17 }
 0x16a   : > { %1896 = vmatprep.subr.mxu0 %v4476_v29  ;;  %2711 = vmatpush1.msk.msra.mxu1 %vm5222_vm8, %v5051_v32  ;;  %vm5255_vm8 = vcmp.eq.s32.totalorder %v3107_v34, %v3078_v13  ;;  %v5262_v34 = vand.u32 4294901760, %v4307_v36 }
 0x16b   : > { %1899 = vmatpush1.msra.mxu0 %v4484_v51  ;;  %1932 = vmatprep.mubr.f32.mxu0 %v5084_v58 }
 0x16c   : > { %2712 = vmatprep.subr.msk.mxu1 %vm431_vm4, %v5051_v32  ;;  %1935 = vmatmul.mubr.f32.vlgmr.msra.gmra.mxu0 %v5224_v14 }
 0x16d   : > { %2713 = vmatpush1.msk.msra.mxu1 %vm5225_vm9, %v5051_v32  ;;  %2050 = vmatprep.subr.mxu0 %v5226_v9  ;;  %vm5257_vm9 = vcmp.eq.s32.totalorder %v3149_v44, %v3082_v17 }
 0x16e   : > { %2714 = vmatprep.subr.msk.mxu1 %vm5227_vm10, %v5051_v32  ;;  %2054 = vmatpush1.msra.mxu0 %v5228_v37  ;;  %vm5259_vm10 = vcmp.eq.s32.totalorder %v3149_v44, %v3078_v13  ;;  %v5266_v44 = vand.u32 4294901760, %v4349_v41 }
 0x16f   : > { %2715 = vmatpush1.msk.msra.mxu1 %vm5229_vm11, %v5051_v32  ;;  %2058 = vmatprep.subr.mxu0 %v5230_v16  ;;  %vm5261_vm11 = vcmp.eq.s32.totalorder %v3201_v54, %v3082_v17 }
 0x170   : > { %2716 = vmatprep.subr.msk.mxu1 %vm5231_vm12, %v5051_v32  ;;  %2062 = vmatpush1.msra.mxu0 %v5232_v6  ;;  %vm5263_vm12 = vcmp.eq.s32.totalorder %v3201_v54, %v3078_v13  ;;  %v5270_v54 = vand.u32 4294901760, %v4361_v46  ;;  %v5276_v46 = vand.u32 4294901760, %v4417_v8 }
 0x171   : > { %2717 = vmatpush1.msk.msra.mxu1 %vm5233_vm13, %v5051_v32  ;;  %2066 = vmatprep.subr.mxu0 %v5234_v24  ;;  %vm5265_vm13 = vcmp.eq.s32.totalorder %v3203_v55, %v3082_v17 }
 0x172   : > { %2718 = vmatprep.subr.msk.mxu1 %vm5235_vm14, %v5051_v32  ;;  %2070 = vmatpush1.msra.mxu0 %v5236_v18  ;;  %vm5267_vm14 = vcmp.eq.s32.totalorder %v3203_v55, %v3078_v13  ;;  %v5274_v55 = vand.u32 4294901760, %v4403_v52 }
 0x173   : > { %2719 = vmatpush1.msk.msra.mxu1 %vm5237_vm7, %v5051_v32  ;;  %2074 = vmatprep.subr.mxu0 %v5238_v0  ;;  %vm5269_vm7 = vcmp.eq.s32.totalorder %v3251_v3, %v3082_v17 }
 0x174   : > { %2720 = vmatprep.subr.msk.mxu1 %vm415_vm5, %v5051_v32  ;;  %2078 = vmatpush1.msra.mxu0 %v5240_v48 }
 0x175   : > { %2721 = vmatpush1.msk.msra.mxu1 %vm5241_vm6, %v5051_v32  ;;  %2037 = vmatprep.mubr.f32.mxu1 %v5084_v58  ;;  %vm5271_vm6 = vcmp.eq.s32.totalorder %v3251_v3, %v3078_v13  ;;  %v5278_v3 = vand.u32 4294901760, %v4431_v25 }
 0x176   : > { %2082 = vmatprep.subr.mxu0 %v5242_v47  ;;  %2041 = vmatmul.mubr.f32.vlgmr.msra.gmra.mxu1 %v5243_v62 }
 0x177   : > { %2086 = vmatpush1.msra.mxu0 %v5244_v40  ;;  %2722 = vmatprep.subr.msk.mxu1 %vm5245_vm15, %v5051_v32  ;;  %vm5273_vm15 = vcmp.eq.s32.totalorder %v3253_v4, %v3082_v17 }
 0x178   : > { %2090 = vmatprep.subr.mxu0 %v5246_v20  ;;  %2723 = vmatpush1.msk.msra.mxu1 %vm5247_vm0, %v5051_v32  ;;  %vm5275_vm0 = vcmp.eq.s32.totalorder %v3253_v4, %v3078_v13  ;;  %v5282_v4 = vand.u32 4294901760, %v4454_v45  ;;  %v606_v20 = vld [vmem:[#allocation2 + $0x18] sm:$0xff] }
 0x179   : > { %2094 = vmatpush1.msra.mxu0 %v5248_v21  ;;  %2724 = vmatprep.subr.msk.mxu1 %vm5249_vm1, %v5051_v32  ;;  %vm5277_vm1 = vcmp.eq.s32.totalorder %v3312_v22, %v3082_v17 }
 0x17a   : > { %2098 = vmatprep.subr.mxu0 %v5250_v2  ;;  %2725 = vmatpush1.msk.msra.mxu1 %vm5251_vm2, %v5051_v32  ;;  %vm5279_vm2 = vcmp.eq.s32.totalorder %v3312_v22, %v3078_v13  ;;  %v5286_v22 = vand.u32 4294901760, %v4476_v29  ;;  %v605_v29 = vld [vmem:[#allocation2] sm:$0xff] }
 0x17b   : > { %2102 = vmatpush1.msra.mxu0 %v5252_v63  ;;  %2726 = vmatprep.subr.msk.mxu1 %vm5253_vm3, %v5051_v32  ;;  %vm5281_vm3 = vcmp.eq.s32.totalorder %v3314_v23, %v3082_v17 }
 0x17c   : > { %2106 = vmatprep.subr.mxu0 %v5254_v33  ;;  %2727 = vmatpush1.msk.msra.mxu1 %vm5255_vm8, %v5051_v32  ;;  %vm5283_vm8 = vcmp.eq.s32.totalorder %v3314_v23, %v3078_v13  ;;  %v607_v33 = vld [vmem:[#allocation2 + $0x8] sm:$0xff] }
 0x17d   : > { %2110 = vmatpush1.msra.mxu0 %v5256_v28  ;;  %2728 = vmatprep.subr.msk.mxu1 %vm5257_vm9, %v5051_v32  ;;  %vm5285_vm9 = vcmp.eq.s32.totalorder %v5220_v49, %v3082_v17 }
 0x17e   : > { %2114 = vmatprep.subr.mxu0 %v5258_v43  ;;  %2729 = vmatpush1.msk.msra.mxu1 %vm5259_vm10, %v5051_v32  ;;  %vm5287_vm10 = vcmp.eq.s32.totalorder %v5220_v49, %v3078_v13 }
 0x17f   : > { %2118 = vmatpush1.msra.mxu0 %v5260_v59  ;;  %2730 = vmatprep.subr.msk.mxu1 %vm5261_vm11, %v5051_v32  ;;  %vm5288_vm11 = vcmp.eq.s32.totalorder %v5223_v5, %v3078_v13 }
 0x180   : > { %2122 = vmatprep.subr.mxu0 %v5262_v34  ;;  %2731 = vmatpush1.msk.msra.mxu1 %vm5263_vm12, %v5051_v32  ;;  %vm5289_vm12 = vcmp.eq.s32.totalorder %v5065_v39, %v3082_v17 }
 0x181   : > { %2126 = vmatpush1.msra.mxu0 %v5264_v11  ;;  %2732 = vmatprep.subr.msk.mxu1 %vm5265_vm13, %v5051_v32  ;;  %vm5290_vm13 = vcmp.eq.s32.totalorder %v5065_v39, %v3078_v13 }
 0x182   : > { %2130 = vmatprep.subr.mxu0 %v5266_v44  ;;  %2733 = vmatpush1.msk.msra.mxu1 %vm5267_vm14, %v5051_v32  ;;  %vm5292_vm14 = vcmp.eq.s32.totalorder %v5072_v1, %v3078_v13 }
 0x183   : > { %2134 = vmatpush1.msra.mxu0 %v5268_v35  ;;  %2734 = vmatprep.subr.msk.mxu1 %vm5269_vm7, %v5051_v32  ;;  %vm5293_vm7 = vcmp.eq.s32.totalorder %v5079_v56, %v3082_v17 }
 0x184   : > { %2138 = vmatprep.subr.mxu0 %v5270_v54  ;;  %2735 = vmatpush1.msk.msra.mxu1 %vm5271_vm6, %v5051_v32  ;;  %vm5294_vm6 = vcmp.eq.s32.totalorder %v5079_v56, %v3078_v13 }
 0x185   : > { %2142 = vmatpush1.msra.mxu0 %v5272_v57  ;;  %2736 = vmatprep.subr.msk.mxu1 %vm5273_vm15, %v5051_v32  ;;  %vm5295_vm15 = vcmp.eq.s32.totalorder %v5239_v50, %v3078_v13 }
 0x186   : > { %2146 = vmatprep.subr.mxu0 %v5274_v55  ;;  %2737 = vmatpush1.msk.msra.mxu1 %vm5275_vm0, %v5051_v32 }
 0x187   : > { %2150 = vmatpush1.msra.mxu0 %v5276_v46  ;;  %2738 = vmatprep.subr.msk.mxu1 %vm5277_vm1, %v5051_v32 }
 0x188   : > { %2154 = vmatprep.subr.mxu0 %v5278_v3  ;;  %2739 = vmatpush1.msk.msra.mxu1 %vm5279_vm2, %v5051_v32 }
 0x189   : > { %2158 = vmatpush1.msra.mxu0 %v5280_v26  ;;  %2740 = vmatprep.subr.msk.mxu1 %vm5281_vm3, %v5051_v32 }
 0x18a   : > { %2162 = vmatprep.subr.mxu0 %v5282_v4  ;;  %2741 = vmatpush1.msk.msra.mxu1 %vm5283_vm8, %v5051_v32 }
 0x18b   : > { %2166 = vmatpush1.msra.mxu0 %v5284_v38  ;;  %2742 = vmatprep.subr.msk.mxu1 %vm5285_vm9, %v5051_v32 }
 0x18c   : > { %2170 = vmatprep.subr.mxu0 %v5286_v22  ;;  %2743 = vmatpush1.msk.msra.mxu1 %vm5287_vm10, %v5051_v32 }
 0x18d   : > { %2174 = vmatpush1.msra.mxu0 %v1760_v61  ;;  %2207 = vmatprep.mubr.f32.mxu0 %v5084_v58 }
 0x18e   : > { %2744 = vmatprep.subr.msk.mxu1 %vm431_vm4, %v5051_v32  ;;  %2209 = vmatmul.mubr.f32.vlgmr.msra.gmra.mxu0 %v3093_v27  ;;  %vm5291_vm4 = vcmp.eq.s32.totalorder %v5072_v1, %v3082_v17 }
 0x18f   : > { %2745 = vmatpush1.msk.msra.mxu1 %vm5288_vm11, %v5051_v32  ;;  %2311 = vmatprep.mubr.f32.mxu1 %v5084_v58 }
 0x190   : > { %2746 = vmatprep.subr.msk.mxu1 %vm5289_vm12, %v5051_v32 }
 0x191   : > { %2747 = vmatpush1.msk.msra.mxu1 %vm5290_vm13, %v5051_v32 }
 0x192   : > { %2748 = vmatprep.subr.msk.mxu1 %vm5291_vm4, %v5051_v32 }
 0x193   : > { %2749 = vmatpush1.msk.msra.mxu1 %vm5292_vm14, %v5051_v32 }
 0x194   : > { %2750 = vmatprep.subr.msk.mxu1 %vm5293_vm7, %v5051_v32 }
 0x195   : > { %2751 = vmatpush1.msk.msra.mxu1 %vm5294_vm6, %v5051_v32 }
 0x196   : > { %2752 = vmatprep.subr.msk.mxu1 %vm415_vm5, %v5051_v32 }
 0x197   : > { %2753 = vmatpush1.msk.msra.mxu1 %vm5295_vm15, %v5051_v32  ;;  %v604_v32 = vld [vmem:[#allocation2 + $0x10] sm:$0xff] }
 0x198   : > { %2313 = vmatmul.mubr.f32.vlgmr.msra.gmra.mxu1 %v3093_v27 }
 0x1a4   : > { %v712_v23 = vpop.f32.mrf.mxu0 }
 0x1a6   : > { %v714_v60 = vpop.f32.mrf.mxu0 }
 0x1b1   : > { %v944_v61 = vpop.f32.mrf.mxu1 }
 0x1b2   : > { %v945_v58 = vadd.f32 %v944_v61, %v712_v23 }
 0x1b3   : > { %v946_v39 = vpop.f32.mrf.mxu1 }
 0x1b4   : > { %v947_v30 = vadd.f32 %v946_v39, %v714_v60 }
 0x1c5   : > { %v1081_v15 = vpop.f32.mrf.mxu0 }
 0x1c6   : > { %v1082_v36 = vadd.f32 %v1081_v15, %v945_v58 }
 0x1c7   : > { %v1083_v1 = vpop.f32.mrf.mxu0 }
 0x1c8   : > { %v1084_v41 = vadd.f32 %v1083_v1, %v947_v30 }
 0x1d1   : > { %v1187_v56 = vpop.f32.mrf.mxu1 }
 0x1d2   : > { %v1188_v10 = vadd.f32 %v1187_v56, %v1082_v36 }
 0x1d3   : > { %v1189_v17 = vpop.f32.mrf.mxu1 }
 0x1d4   : > { %v1190_v8 = vadd.f32 %v1189_v17, %v1084_v41 }
 0x1e8   : > { %v1355_v19 = vpop.f32.mrf.mxu0 }
 0x1e9   : > { %v1356_v13 = vadd.f32 %v1355_v19, %v1188_v10 }
 0x1ea   : > { %v1357_v52 = vpop.f32.mrf.mxu0 }
 0x1eb   : > { %v1358_v27 = vadd.f32 %v1357_v52, %v1190_v8 }
 0x1f2   : > { %v1459_v25 = vpop.f32.mrf.mxu1 }
 0x1f3   : > { %v1460_v45 = vadd.f32 %v1459_v25, %v1356_v13 }
 0x1f4   : > { %v1461_v51 = vpop.f32.mrf.mxu1 }
 0x1f5   : > { %v2319_v42 = vadd.f32 %v1460_v45, %v604_v32  ;;  %v1462_v31 = vadd.f32 %v1461_v51, %v1358_v27 }
 0x1f7   : > { %2323 = vst [vmem:[#allocation2 + $0x10] sm:$0xff] %v2319_v42  ;;  %v2320_v7 = vadd.f32 %v1462_v31, %v605_v29 }
 0x1f9   : > { %2324 = vst [vmem:[#allocation2] sm:$0xff] %v2320_v7 }
 0x20b   : > { %v1567_v53 = vpop.f32.mrf.mxu0 }
 0x20d   : > { %v1569_v12 = vpop.f32.mrf.mxu0 }
 0x214   : > { %v1799_v49 = vpop.f32.mrf.mxu1 }
 0x215   : > { %v1800_v16 = vadd.f32 %v1799_v49, %v1567_v53 }
 0x216   : > { %v1801_v14 = vpop.f32.mrf.mxu1 }
 0x217   : > { %v1802_v24 = vadd.f32 %v1801_v14, %v1569_v12 }
 0x22c   : > { %v1936_v5 = vpop.f32.mrf.mxu0 }
 0x22d   : > { %v1937_v18 = vadd.f32 %v1936_v5, %v1800_v16 }
 0x22e   : > { %v1938_v9 = vpop.f32.mrf.mxu0 }
 0x22f   : > { %v1939_v50 = vadd.f32 %v1938_v9, %v1802_v24 }
 0x236   : > { %v2042_v37 = vpop.f32.mrf.mxu1 }
 0x237   : > { %v2043_v48 = vadd.f32 %v2042_v37, %v1937_v18 }
 0x238   : > { %v2044_v0 = vpop.f32.mrf.mxu1 }
 0x239   : > { %v2045_v62 = vadd.f32 %v2044_v0, %v1939_v50 }
 0x24e   : > { %v2210_v6 = vpop.f32.mrf.mxu0 }
 0x24f   : > { %v2211_v40 = vadd.f32 %v2210_v6, %v2043_v48 }
 0x250   : > { %v2212_v47 = vpop.f32.mrf.mxu0 }
 0x251   : > { %v2213_v2 = vadd.f32 %v2212_v47, %v2045_v62 }
 0x258   : > { %v2314_v21 = vpop.f32.mrf.mxu1 }
 0x259   : > { %v2315_v63 = vadd.f32 %v2314_v21, %v2211_v40 }
 0x25a   : > { %v2316_v28 = vpop.f32.mrf.mxu1 }
 0x25b   : > { %v2321_v43 = vadd.f32 %v2315_v63, %v606_v20  ;;  %v2317_v59 = vadd.f32 %v2316_v28, %v2213_v2 }
 0x25d   : > { %2325 = vst [vmem:[#allocation2 + $0x18] sm:$0xff] %v2321_v43  ;;  %v2322_v34 = vadd.f32 %v2317_v59, %v607_v33 }
 0x25f   : > { %2326 = vst [vmem:[#allocation2 + $0x8] sm:$0xff] %v2322_v34 }
 0x260 PF: > { %v2330_v11 = vld [vmem:[#allocation2 + $0x10] sm:$0xff]  ;;  %v2331_v44 = vld [vmem:[#allocation2] sm:$0xff]  ;;  %v2342_v26 = vlaneseq  ;;  %s2777_s13 = sshll.u32 %s2943_s26, 8  ;;  %s2389_s15 = sshll.u32 %s3067_s16, 4  ;;  %s2390_s15 = int_to_ptr.vmem [resolvable:$true] %s2389_s15 }
 0x261   : > { %v2334_v54 = vmax.f32 %v2330_v11, 1.0  ;;  %v2335_v57 = vmax.f32 %v2331_v44, 1.0  ;;  %s2387_s20 = scalar_lea.hbm %s4945_s4, %s2777_s13  ;;  %s2373_s21 = scalar_lea.sflag [#allocation7], %s271_s11 }
 0x262   : > { %v2343_v4 = vshrl.u32 %v2342_v26, 7  ;;  %s2873_s22 = scalar_lea.vmem %s2390_s15, 256  ;;  %s2959_s23 = smov [#allocation6]  }
 0x263   : > { %2841 = vrcp.f32 %v2334_v54  ;;  %p2874_p12 = scmp.ne.s32.totalorder %s2390_s15, %s2873_s22  ;;  %s2877_s26 = sshll.u32 %s2959_s23, 4  ;;  %s2878_s26 = int_to_ptr.vmem [resolvable:$false] %s2877_s26 }
 0x264   : > { %v2332_v35 = vld [vmem:[#allocation2 + $0x18] sm:$0xff]  ;;  %2843 = vrcp.f32 %v2335_v57  ;;  %v2344_v38 = vsub.s32 4, %v2343_v4  ;;  %s2879_s0 = scalar_lea.vmem %s2878_s26, 512  ;;  %p2880_p2 = scmp.lt.s32.totalorder %s2390_s15, %s2878_s26 }
 0x265   : > { %v2336_v46 = vmax.f32 %v2332_v35, 1.0  ;;  %p2875_p13 = pnand %p2874_p12, %p3031_p0  ;;  %p2881_p3 = scmp.lt.s32.totalorder %s2879_s0, %s2873_s22 }
 0x266   : > { %v2333_v55 = vld [vmem:[#allocation2 + $0x8] sm:$0xff] }
 0x267   : > { %v2337_v3 = vmax.f32 %v2333_v55, 1.0  ;;  %2845 = vrcp.f32 %v2336_v46  ;;  %p2876_p1 = pneg %p2875_p13  ;;  %p2882_p5 = por %p2881_p3, %p2880_p2 }
 0x269   : > { %2847 = vrcp.f32 %v2337_v3  ;;  %p2883_p6 = pnand %p2882_p5, %p2876_p1 }
 0x270   : > { %v2842_v22 = vpop.eup %2841 }
 0x271   : > { %v2844_v23 = vpop.eup %2843  ;;  %v2345_v60 = vrot.slane %v2842_v22, %v2344_v38 }
 0x272   : > { %v2349_v15 = vrot.slane %v2844_v23, %v2344_v38 }
 0x273   : > { %v2358_v1 = vmul.f32 %v2345_v60, %v2330_v11 }
 0x274   : > { %v2846_v61 = vpop.eup %2845  ;;  %v2359_v58 = vmul.f32 %v2349_v15, %v2331_v44 }
 0x275   : > { %v2353_v56 = vrot.slane %v2846_v61, %v2344_v38 }
 0x276   : > { %v2848_v39 = vpop.eup %2847  ;;  %v2366_v36 = vcombine.low %v2358_v1, %v2359_v58 }
 0x277   : > { %v2357_v19 = vrot.slane %v2848_v39, %v2344_v38  ;;  %v2360_v30 = vmul.f32 %v2353_v56, %v2332_v35 }
 0x278   : > { %2370 = vst [vmem:[%s3067_s16] sm:$0xff] %v2366_v36 }
 0x279   : > { %v2361_v17 = vmul.f32 %v2357_v19, %v2333_v55 }
 0x27b   : > { %v2367_v41 = vcombine.low %v2360_v30, %v2361_v17 }
 0x27d   : > { %2371 = vst [vmem:[%s3067_s16 + $0x8] sm:$0xff] %v2367_v41 }
 0x27e   : > { %2886 = shalt.err (!%p2883_p6)
}
 0x27f   : > { %s2887_s29 = scalar_lea.hbm %s2387_s20, 256  ;;  %s2891_s6 = scalar_lea.hbm %s4945_s4, 512 }
 0x280   : > { %p2888_p7 = scmp.ne.s32.totalorder %s2387_s20, %s2887_s29  ;;  %p2892_p10 = scmp.lt.s32.totalorder %s2387_s20, %s4945_s4 }
 0x281   : > { %p2893_p11 = scmp.lt.s32.totalorder %s2891_s6, %s2887_s29 }
 0x282   : > { %p2889_p8 = pnand %p2888_p7, %p3031_p0 }
 0x283   : > { %p2894_p12 = por %p2893_p11, %p2892_p10 }
 0x284   : > { %p2890_p9 = pneg %p2889_p8 }
 0x286   : > { %p2895_p13 = pnand %p2894_p12, %p2890_p9 }
 0x288   : > { %2898 = shalt.err (!%p2895_p13)
}
 0x289   : > { %2778 = dma.vmem_to_hbm [thread:$0]  (%p3031_p0), %s2390_s15, 256, %s2387_s20, %s2373_s21  }
 0x28a PF: > { %p2784_p1 = scmp.ge.s32.totalorder %s2951_s28, 2  ;;  %s2401_s14 = sand.u32 1, %s2931_s1  }
 0x28b   : > { %s2402_s16 = scalar_lea.sflag [#allocation7], %s2401_s14 }
 0x28c   : > { %p2781_p2 = pnand %p2784_p1, %p3038_p4 }
 0x28e   : > { %p2782_p3 = pneg %p2781_p2 }
 0x290   : > { %2926 = dma.done.wait (%p2782_p3), %s2402_s16, 256  }
 0x291   : > { %2928 = vsyncadd (%p2782_p3), %s2402_s16, 4294967040  ;;  %s27_s28 = sadd.s32 1, %s2951_s28   ;;  %s5296_s1 = smov %s2935_s24 }
 0x292   : > { %p24_p5 = scmp.ge.s32.totalorder %s27_s28, 4   ;;  %s5297_s24 = smov %s2939_s25 }
 0x293   : > { %s5298_s25 = smov %s3044_s10  ;;  %s5299_s26 = smov %s2947_s27 }
 0x294   : > { %s5300_s27 = smov %s5302_s5  ;;  %26 = sbr.rel (!%p24_p5) target bundleno = 29 (0x1d), region = 78 }
 0x299   :  { %2407 = vsyncpa [#allocation7], 1 }
 0x29a   :  { %2409 = vsyncpa [#allocation7 + $0x1], 1 }

</bundles_post_ra>
